<compile_context>
chip_gen: v7x
topology: tpu7x:2x2x1
jax: 0.10.0
libtpu: 0.0.40
codegen_flags: <defaults>
</compile_context>

<pallas_src>
import math
import functools

import jax
import jax.numpy as jnp
from jax import lax
from jax.experimental import pallas as pl
from jax.experimental.pallas import tpu as pltpu

PAD = 0  # onmt.Constants.PAD


# ------------------------------- helpers ----------------------------------- #

def _row_tile(n, target=256):
    """Largest row tile <= target that divides n and is a multiple of 8."""
    if n <= target:
        return n
    t = target - (target % 8)
    while t >= 8:
        if n % t == 0:
            return t
        t -= 8
    # Fallback: full extent (valid per the (8,128) rule since it equals the array dim).
    return n


def _seq_tile(L, target):
    """Largest sequence tile <= target that divides L and is a multiple of 128."""
    if L <= target:
        return L
    t = (target // 128) * 128
    while t >= 128:
        if L % t == 0:
            return t
        t -= 128
    return L


@functools.lru_cache(maxsize=None)
def _vmem_limit_bytes():
    cap = 64 * 1024 * 1024
    try:
        info = pltpu.get_tpu_info()
        cap = int(getattr(info, "vmem_capacity_bytes", cap))
    except Exception:
        pass
    # ~3/4 of physical VMEM: ~48 MiB on v7x (64 MiB), ~96 MiB on v5e/v6e (128 MiB).
    return min(max(cap * 3 // 4, 32 * 1024 * 1024), 112 * 1024 * 1024)


def _cparams(*semantics):
    return pltpu.CompilerParams(
        dimension_semantics=semantics,
        vmem_limit_bytes=_vmem_limit_bytes(),
    )


def _ln(x, g, b):
    # One-pass stats: E[x], E[x^2]  (saves one cross-lane reduction vs two-pass).
    mean = jnp.mean(x, axis=-1, keepdims=True)
    meansq = jnp.mean(x * x, axis=-1, keepdims=True)
    var = meansq - mean * mean
    return (x - mean) * lax.rsqrt(var + 1e-5) * g + b


# ----------------------------- Pallas kernels ------------------------------ #

def _scale_pe_kernel(emb_ref, pe_ref, o_ref, *, scale):
    # emb * sqrt(d_model) + positional_encoding (PE block reused across batch)
    o_ref[0] = emb_ref[0] * scale + pe_ref[...]


def scale_add_pe(emb, pe, scale):
    B, L, D = emb.shape
    tl = _row_tile(L, 512)
    return pl.pallas_call(
        functools.partial(_scale_pe_kernel, scale=scale),
        out_shape=jax.ShapeDtypeStruct((B, L, D), jnp.float32),
        grid=(B, L // tl),
        in_specs=[pl.BlockSpec((1, tl, D), lambda b, l: (b, l, 0)),
                  pl.BlockSpec((tl, D), lambda b, l: (l, 0))],
        out_specs=pl.BlockSpec((1, tl, D), lambda b, l: (b, l, 0)),
        compiler_params=_cparams("parallel", "parallel"),
    )(emb, pe)


def _layernorm_kernel(x_ref, g_ref, b_ref, o_ref):
    o_ref[...] = _ln(x_ref[...], g_ref[...], b_ref[...])


def layernorm(x2d, gamma, beta):
    N, D = x2d.shape
    tm = _row_tile(N, 512)
    return pl.pallas_call(
        _layernorm_kernel,
        out_shape=jax.ShapeDtypeStruct((N, D), jnp.float32),
        grid=(N // tm,),
        in_specs=[pl.BlockSpec((tm, D), lambda i: (i, 0)),
                  pl.BlockSpec((1, D), lambda i: (0, 0)),
                  pl.BlockSpec((1, D), lambda i: (0, 0))],
        out_specs=pl.BlockSpec((tm, D), lambda i: (i, 0)),
        compiler_params=_cparams("parallel"),
    )(x2d, gamma.reshape(1, D), beta.reshape(1, D))


def _ln_qkv_kernel(x_ref, g_ref, b_ref, w_ref, bias_ref, o_ref):
    # fused: LayerNorm -> [Wq|Wk|Wv] projection (bf16 MXU, f32 accumulate, bf16 store)
    xn = _ln(x_ref[...], g_ref[...], b_ref[...])
    y = jnp.dot(xn.astype(w_ref.dtype), w_ref[...],
                preferred_element_type=jnp.float32) + bias_ref[...]
    o_ref[...] = y.astype(o_ref.dtype)


def ln_qkv(x2d, gamma, beta, wqkv, bqkv):
    N, D = x2d.shape
    Dout = wqkv.shape[1]
    tm = _row_tile(N, 256)
    return pl.pallas_call(
        _ln_qkv_kernel,
        out_shape=jax.ShapeDtypeStruct((N, Dout), jnp.bfloat16),   # bf16 intermediate in HBM
        grid=(N // tm,),
        in_specs=[pl.BlockSpec((tm, D), lambda i: (i, 0)),
                  pl.BlockSpec((1, D), lambda i: (0, 0)),
                  pl.BlockSpec((1, D), lambda i: (0, 0)),
                  pl.BlockSpec((D, Dout), lambda i: (0, 0)),
                  pl.BlockSpec((1, Dout), lambda i: (0, 0))],
        out_specs=pl.BlockSpec((tm, Dout), lambda i: (i, 0)),
        compiler_params=_cparams("parallel"),
    )(x2d, gamma.reshape(1, D), beta.reshape(1, D), wqkv, bqkv.reshape(1, Dout))


def _flash_attn_kernel(q_ref, k_ref, v_ref, bias_ref, wo_ref, bo_ref, res_ref,
                       o_ref, m_sc, l_sc, acc_sc, oacc_sc, *, head_dim):
    # grid = (B, Q-blocks, H, KV-blocks); H and KV are "arbitrary" (sequential) axes.
    h = pl.program_id(2)
    ki = pl.program_id(3)
    last_h = pl.num_programs(2) - 1
    last_k = pl.num_programs(3) - 1

    @pl.when((h == 0) & (ki == 0))
    def _():
        oacc_sc[...] = jnp.zeros(oacc_sc.shape, jnp.float32)

    @pl.when(ki == 0)
    def _():
        m_sc[...] = jnp.full(m_sc.shape, -jnp.inf, jnp.float32)
        l_sc[...] = jnp.zeros(l_sc.shape, jnp.float32)
        acc_sc[...] = jnp.zeros(acc_sc.shape, jnp.float32)

    q = q_ref[0, 0]                       # (tq, Dh) bf16, already scaled by 1/sqrt(Dh)
    k = k_ref[0, 0]                       # (tk, Dh) bf16
    s = lax.dot_general(q, k, (((1,), (1,)), ((), ())),
                        preferred_element_type=jnp.float32)       # (tq, tk) on MXU
    s = s + bias_ref[0]                   # additive finite mask bias (0 / -1e30)

    m_prev = m_sc[...]
    m_new = jnp.maximum(m_prev, jnp.max(s, axis=-1, keepdims=True))
    alpha = jnp.exp(m_prev - m_new)
    p = jnp.exp(s - m_new)
    l_sc[...] = alpha * l_sc[...] + jnp.sum(p, axis=-1, keepdims=True)
    acc_sc[...] = alpha * acc_sc[...] + jnp.dot(p.astype(v_ref.dtype), v_ref[0, 0],
                                                preferred_element_type=jnp.float32)
    m_sc[...] = m_new

    @pl.when(ki == last_k)
    def _():
        # per-head epilogue: normalize and accumulate o_h @ Wo[h*Dh:(h+1)*Dh, :]
        o_h = acc_sc[...] * pl.reciprocal(l_sc[...], approx=True)   # (tq, Dh) f32
        row = pl.multiple_of(h * head_dim, head_dim)
        wo_h = wo_ref[pl.ds(row, head_dim), :]                       # (Dh, D) bf16
        oacc_sc[...] += jnp.dot(o_h.astype(wo_h.dtype), wo_h,
                                preferred_element_type=jnp.float32)

    @pl.when((h == last_h) & (ki == last_k))
    def _():
        # fused output-projection bias + residual add; single f32 write per q-block
        o_ref[0] = res_ref[0] + oacc_sc[...] + bo_ref[...]


def flash_attention_proj_residual(q, k, v, attn_bias, wo, bo, x3, *, n_heads, head_dim):
    # q, k, v: (B, H, L, Dh) bf16.  attn_bias: (B, 1, L) f32.  x3 (residual): (B, L, D) f32.
    B, H, L, Dh = q.shape
    D = n_heads * head_dim
    tq = _seq_tile(L, 256)
    tk = _seq_tile(L, 512)
    grid = (B, L // tq, n_heads, L // tk)
    return pl.pallas_call(
        functools.partial(_flash_attn_kernel, head_dim=head_dim),
        out_shape=jax.ShapeDtypeStruct((B, L, D), jnp.float32),
        grid=grid,
        in_specs=[pl.BlockSpec((1, 1, tq, Dh), lambda b, qi, h, ki: (b, h, qi, 0)),
                  pl.BlockSpec((1, 1, tk, Dh), lambda b, qi, h, ki: (b, h, ki, 0)),
                  pl.BlockSpec((1, 1, tk, Dh), lambda b, qi, h, ki: (b, h, ki, 0)),
                  pl.BlockSpec((1, 1, tk), lambda b, qi, h, ki: (b, 0, ki)),
                  pl.BlockSpec((D, D), lambda b, qi, h, ki: (0, 0)),
                  pl.BlockSpec((1, D), lambda b, qi, h, ki: (0, 0)),
                  pl.BlockSpec((1, tq, D), lambda b, qi, h, ki: (b, qi, 0))],
        out_specs=pl.BlockSpec((1, tq, D), lambda b, qi, h, ki: (b, qi, 0)),
        scratch_shapes=[pltpu.VMEM((tq, 1), jnp.float32),        # running max
                        pltpu.VMEM((tq, 1), jnp.float32),        # running denom
                        pltpu.VMEM((tq, head_dim), jnp.float32),  # per-head PV acc
                        pltpu.VMEM((tq, D), jnp.float32)],        # fused Wo output acc
        compiler_params=_cparams("parallel", "parallel", "arbitrary", "arbitrary"),
    )(q, k, v, attn_bias, wo, bo.reshape(1, D), x3)


def _ffn_kernel(x_ref, g_ref, b_ref, w1_ref, b1_ref, w2_ref, b2_ref, o_ref):
    # fused: LayerNorm -> W1 -> ReLU -> W2 -> residual add (bf16 MXU, f32 accumulate)
    x = x_ref[...]
    xn = _ln(x, g_ref[...], b_ref[...])
    h = jnp.dot(xn.astype(w1_ref.dtype), w1_ref[...],
                preferred_element_type=jnp.float32) + b1_ref[...]
    h = jnp.maximum(h, 0.0)
    f = jnp.dot(h.astype(w2_ref.dtype), w2_ref[...],
                preferred_element_type=jnp.float32) + b2_ref[...]
    o_ref[...] = x + f


def ffn_residual(x2d, gamma, beta, w1, b1, w2, b2):
    N, D = x2d.shape
    inner = w1.shape[1]
    tm = _row_tile(N, 256)
    return pl.pallas_call(
        _ffn_kernel,
        out_shape=jax.ShapeDtypeStruct((N, D), jnp.float32),
        grid=(N // tm,),
        in_specs=[pl.BlockSpec((tm, D), lambda i: (i, 0)),
                  pl.BlockSpec((1, D), lambda i: (0, 0)),
                  pl.BlockSpec((1, D), lambda i: (0, 0)),
                  pl.BlockSpec((D, inner), lambda i: (0, 0)),
                  pl.BlockSpec((1, inner), lambda i: (0, 0)),
                  pl.BlockSpec((inner, D), lambda i: (0, 0)),
                  pl.BlockSpec((1, D), lambda i: (0, 0))],
        out_specs=pl.BlockSpec((tm, D), lambda i: (i, 0)),
        compiler_params=_cparams("parallel"),
    )(x2d, gamma.reshape(1, D), beta.reshape(1, D),
      w1, b1.reshape(1, inner), w2, b2.reshape(1, D))


# --------------------------------- glue ------------------------------------ #

def sinusoidal_pe(L, D):
    pos = jnp.arange(L, dtype=jnp.float32)[:, None]
    dim = jnp.arange(0, D, 2, dtype=jnp.float32)[None, :]
    div = jnp.exp(-math.log(10000.0) * dim / D)
    pe = jnp.zeros((L, D), dtype=jnp.float32)
    pe = pe.at[:, 0::2].set(jnp.sin(pos * div))
    pe = pe.at[:, 1::2].set(jnp.cos(pos * div))
    return pe


def init_params(key, vocab, D, inner, n_layers):
    keys = iter(jax.random.split(key, 1 + 4 * n_layers))

    def w(shape, scale=0.02, dtype=jnp.bfloat16):     # bf16 MXU weights
        return (scale * jax.random.normal(next(keys), shape)).astype(dtype)

    params = {
        'embedding': w((vocab, D), dtype=jnp.float32),
        'ln_out_g': jnp.ones((D,), jnp.float32),
        'ln_out_b': jnp.zeros((D,), jnp.float32),
        'layers': [],
    }
    for _ in range(n_layers):
        params['layers'].append({
            'ln_attn_g': jnp.ones((D,), jnp.float32),
            'ln_attn_b': jnp.zeros((D,), jnp.float32),
            'wqkv': w((D, 3 * D)), 'bqkv': jnp.zeros((3 * D,), jnp.float32),
            'wo': w((D, D)), 'bo': jnp.zeros((D,), jnp.float32),
            'ln_ffn_g': jnp.ones((D,), jnp.float32),
            'ln_ffn_b': jnp.zeros((D,), jnp.float32),
            'w1': w((D, inner)), 'b1': jnp.zeros((inner,), jnp.float32),
            'w2': w((inner, D)), 'b2': jnp.zeros((D,), jnp.float32),
        })
    return params


def transformer_encoder(tokens, params, *, n_heads):
    """tokens: (B, L) int32.  Returns {'context': (L, B, D), 'src_mask': (B, 1, L) bool}."""
    B, L = tokens.shape
    D = params['embedding'].shape[1]
    assert D % n_heads == 0
    Dh = D // n_heads
    N = B * L

    mask_src = (tokens == PAD)[:, None, :]                               # (B, 1, L) bool
    # additive, finite mask bias: safe even for fully-padded rows, one add in-kernel
    attn_bias = jnp.where(mask_src, jnp.float32(-1e30), jnp.float32(0.0))

    # TODO(synk): embedding gather (word_lut) + word/emb dropout kept in XLA (eval => dropout=0).
    emb = jnp.take(params['embedding'], tokens, axis=0)                  # (B, L, D)

    pe = sinusoidal_pe(L, D)                                             # (L, D), reused per batch
    x = scale_add_pe(emb, pe, math.sqrt(D)).reshape(N, D)                # (B*L, D) f32 residual stream

    attn_scale = 1.0 / math.sqrt(Dh)

    for lp in params['layers']:
        # fold 1/sqrt(Dh) into the Q projection (tiny per-layer op; removes L^2 score scaling)
        wqkv = lp['wqkv'].at[:, :D].multiply(jnp.asarray(attn_scale, lp['wqkv'].dtype))
        bqkv = lp['bqkv'].at[:D].multiply(attn_scale)

        # --- self-attention sublayer: x = x + Wo·MHA(LN(x)) ---
        qkv = ln_qkv(x, lp['ln_attn_g'], lp['ln_attn_b'], wqkv, bqkv)    # (N, 3D) bf16
        # head-major layout for lane-aligned flash blocks.
        # TODO(synk): fold this bf16 transpose into the ln_qkv out_spec once Mosaic
        # supports cheap in-kernel lane-splitting reshapes for Dh < 128.
        qkvh = qkv.reshape(B, L, 3, n_heads, Dh).transpose(2, 0, 3, 1, 4)  # (3, B, H, L, Dh)
        x = flash_attention_proj_residual(
            qkvh[0], qkvh[1], qkvh[2], attn_bias, lp['wo'], lp['bo'],
            x.reshape(B, L, D), n_heads=n_heads, head_dim=Dh).reshape(N, D)

        # --- feed-forward sublayer: x = x + W2·relu(W1·LN(x)) ---
        x = ffn_residual(x, lp['ln_ffn_g'], lp['ln_ffn_b'],
                         lp['w1'], lp['b1'], lp['w2'], lp['b2'])

    x = layernorm(x, params['ln_out_g'], params['ln_out_b'])             # postprocess_layer ('n')
    # TODO(synk): final (B,L,D)->(L,B,D) transpose kept in XLA (one small pass).
    context = x.reshape(B, L, D).transpose(1, 0, 2)                      # (L, B, D) like PyTorch
    return {'context': context, 'src_mask': mask_src}


# --------------------------------- main ------------------------------------ #

if __name__ == "__main__":
    B, L, D, H, INNER, LAYERS, VOCAB = 2, 16, 128, 4, 256, 2, 100

    key = jax.random.PRNGKey(0)
    k_tok, k_par = jax.random.split(key)

    tokens = jax.random.randint(k_tok, (B, L), 1, VOCAB, dtype=jnp.int32)
    tokens = tokens.at[1, L - 3:].set(PAD)   # a few padded positions in sequence 1

    params = init_params(k_par, VOCAB, D, INNER, LAYERS)

    fwd = jax.jit(functools.partial(transformer_encoder, n_heads=H))
    out = fwd(tokens, params)
    jax.block_until_ready(out['context'])

    assert out['context'].shape == (L, B, D)
    assert out['src_mask'].shape == (B, 1, L)
    assert bool(jnp.all(jnp.isfinite(out['context'])))
    print("KERNEL_OK")
</pallas_src>

<mosaic_0001>
module attributes {stable_mosaic.version = 11 : i64} {
  func.func @_scale_pe_kernel(%arg0: i32, %arg1: i32, %arg2: memref<1x16x128xf32, #tpu.memory_space<vmem>>, %arg3: memref<16x128xf32, #tpu.memory_space<vmem>>, %arg4: memref<1x16x128xf32, #tpu.memory_space<vmem>>) attributes {dimension_semantics = [#tpu.dimension_semantics<parallel>, #tpu.dimension_semantics<parallel>], iteration_bounds = array<i64: 2, 1>, scalar_prefetch = 0 : i64, scratch_operands = 0 : i64, tpu.core_type = #tpu.core_type<tc>, window_params = [{transform_indices = @transform_0, window_bounds = array<i64: 1, 16, 128>}, {transform_indices = @transform_1, window_bounds = array<i64: 16, 128>}, {transform_indices = @transform_2, window_bounds = array<i64: 1, 16, 128>}]} {
    %c0 = arith.constant 0 : index
    %c0_0 = arith.constant 0 : index
    %c0_1 = arith.constant 0 : index
    %0 = vector.load %arg2[%c0, %c0_0, %c0_1] : memref<1x16x128xf32, #tpu.memory_space<vmem>>, vector<1x16x128xf32>
    %1 = vector.shape_cast %0 : vector<1x16x128xf32> to vector<16x128xf32>
    %cst = arith.constant 11.3137083 : f32
    %2 = vector.broadcast %cst : f32 to vector<16x128xf32>
    %3 = arith.mulf %1, %2 : vector<16x128xf32>
    %c0_2 = arith.constant 0 : index
    %c0_3 = arith.constant 0 : index
    %4 = vector.load %arg3[%c0_2, %c0_3] : memref<16x128xf32, #tpu.memory_space<vmem>>, vector<16x128xf32>
    %5 = arith.addf %3, %4 : vector<16x128xf32>
    %c0_4 = arith.constant 0 : index
    %c0_5 = arith.constant 0 : index
    %c0_6 = arith.constant 0 : index
    %6 = vector.load %arg4[%c0_4, %c0_5, %c0_6] : memref<1x16x128xf32, #tpu.memory_space<vmem>>, vector<1x16x128xf32>
    %7 = vector.shape_cast %6 : vector<1x16x128xf32> to vector<16x128xf32>
    %8 = vector.shape_cast %5 : vector<16x128xf32> to vector<1x16x128xf32>
    tpu.vector_store %arg4[%c0_4, %c0_5, %c0_6], %8 {strides = array<i32>} : memref<1x16x128xf32, #tpu.memory_space<vmem>>, vector<1x16x128xf32>,
    return
  }
  func.func @transform_0(%arg0: i32, %arg1: i32) -> (i32, i32, i32) {
    %c0_i32 = arith.constant 0 : i32
    %c0_i32_0 = arith.constant 0 : i32
    return %arg0, %arg1, %c0_i32 : i32, i32, i32
  }
  func.func @transform_1(%arg0: i32, %arg1: i32) -> (i32, i32) {
    %c0_i32 = arith.constant 0 : i32
    %c0_i32_0 = arith.constant 0 : i32
    return %arg1, %c0_i32 : i32, i32
  }
  func.func @transform_2(%arg0: i32, %arg1: i32) -> (i32, i32, i32) {
    %c0_i32 = arith.constant 0 : i32
    %c0_i32_0 = arith.constant 0 : i32
    return %arg0, %arg1, %c0_i32 : i32, i32, i32
  }
}

module attributes {stable_mosaic.version = 11 : i64} {
  func.func @_ln_qkv_kernel(%arg0: i32, %arg1: memref<32x128xf32, #tpu.memory_space<vmem>>, %arg2: memref<1x128xf32, #tpu.memory_space<vmem>>, %arg3: memref<1x128xf32, #tpu.memory_space<vmem>>, %arg4: memref<128x384xbf16, #tpu.memory_space<vmem>>, %arg5: memref<1x384xf32, #tpu.memory_space<vmem>>, %arg6: memref<32x384xbf16, #tpu.memory_space<vmem>>) attributes {dimension_semantics = [#tpu.dimension_semantics<parallel>], iteration_bounds = array<i64: 1>, scalar_prefetch = 0 : i64, scratch_operands = 0 : i64, tpu.core_type = #tpu.core_type<tc>, window_params = [{transform_indices = @transform_0, window_bounds = array<i64: 32, 128>}, {pipeline_mode = #tpu.pipeline_mode<synchronous>, transform_indices = @transform_1, window_bounds = array<i64: 1, 128>}, {pipeline_mode = #tpu.pipeline_mode<synchronous>, transform_indices = @transform_2, window_bounds = array<i64: 1, 128>}, {pipeline_mode = #tpu.pipeline_mode<synchronous>, transform_indices = @transform_3, window_bounds = array<i64: 128, 384>}, {pipeline_mode = #tpu.pipeline_mode<synchronous>, transform_indices = @transform_4, window_bounds = array<i64: 1, 384>}, {transform_indices = @transform_5, window_bounds = array<i64: 32, 384>}]} {
    %c0 = arith.constant 0 : index
    %c0_0 = arith.constant 0 : index
    %0 = vector.load %arg1[%c0, %c0_0] : memref<32x128xf32, #tpu.memory_space<vmem>>, vector<32x128xf32>
    %c0_1 = arith.constant 0 : index
    %c0_2 = arith.constant 0 : index
    %1 = vector.load %arg2[%c0_1, %c0_2] : memref<1x128xf32, #tpu.memory_space<vmem>>, vector<1x128xf32>
    %c0_3 = arith.constant 0 : index
    %c0_4 = arith.constant 0 : index
    %2 = vector.load %arg3[%c0_3, %c0_4] : memref<1x128xf32, #tpu.memory_space<vmem>>, vector<1x128xf32>
    %cst = arith.constant dense<0.000000e+00> : vector<32xf32>
    %3 = vector.multi_reduction <add>, %0, %cst [1] : vector<32x128xf32> to vector<32xf32>
    %4 = vector.shape_cast %3 : vector<32xf32> to vector<32x1xf32>
    %cst_5 = arith.constant 1.280000e+02 : f32
    %5 = vector.broadcast %cst_5 : f32 to vector<32x1xf32>
    %6 = arith.divf %4, %5 : vector<32x1xf32>
    %7 = arith.mulf %0, %0 : vector<32x128xf32>
    %cst_6 = arith.constant dense<0.000000e+00> : vector<32xf32>
    %8 = vector.multi_reduction <add>, %7, %cst_6 [1] : vector<32x128xf32> to vector<32xf32>
    %9 = vector.shape_cast %8 : vector<32xf32> to vector<32x1xf32>
    %cst_7 = arith.constant 1.280000e+02 : f32
    %10 = vector.broadcast %cst_7 : f32 to vector<32x1xf32>
    %11 = arith.divf %9, %10 : vector<32x1xf32>
    %12 = arith.mulf %6, %6 : vector<32x1xf32>
    %13 = arith.subf %11, %12 : vector<32x1xf32>
    %14 = vector.broadcast %6 : vector<32x1xf32> to vector<32x128xf32>
    %15 = arith.subf %0, %14 : vector<32x128xf32>
    %cst_8 = arith.constant 9.99999974E-6 : f32
    %16 = vector.broadcast %cst_8 : f32 to vector<32x1xf32>
    %17 = arith.addf %13, %16 : vector<32x1xf32>
    %18 = math.rsqrt %17 : vector<32x1xf32>
    %19 = vector.broadcast %18 : vector<32x1xf32> to vector<32x128xf32>
    %20 = arith.mulf %15, %19 : vector<32x128xf32>
    %21 = vector.broadcast %1 : vector<1x128xf32> to vector<32x128xf32>
    %22 = arith.mulf %20, %21 : vector<32x128xf32>
    %23 = vector.broadcast %2 : vector<1x128xf32> to vector<32x128xf32>
    %24 = arith.addf %22, %23 : vector<32x128xf32>
    %25 = arith.truncf %24 : vector<32x128xf32> to vector<32x128xbf16>
    %c0_9 = arith.constant 0 : index
    %c0_10 = arith.constant 0 : index
    %26 = vector.load %arg4[%c0_9, %c0_10] : memref<128x384xbf16, #tpu.memory_space<vmem>>, vector<128x384xbf16>
    %cst_11 = arith.constant dense<0.000000e+00> : vector<32x384xf32>
    %27 = tpu.matmul %25, %26, %cst_11 {dimension_numbers = #tpu.dot_dimension_numbers<[1], [0], [0], [1], [0, 0, 1, 1], [], []>} : vector<32x128xbf16>, vector<128x384xbf16>, vector<32x384xf32> -> vector<32x384xf32>
    %c0_12 = arith.constant 0 : index
    %c0_13 = arith.constant 0 : index
    %28 = vector.load %arg5[%c0_12, %c0_13] : memref<1x384xf32, #tpu.memory_space<vmem>>, vector<1x384xf32>
    %29 = vector.broadcast %28 : vector<1x384xf32> to vector<32x384xf32>
    %30 = arith.addf %27, %29 : vector<32x384xf32>
    %31 = arith.truncf %30 : vector<32x384xf32> to vector<32x384xbf16>
    %c0_14 = arith.constant 0 : index
    %c0_15 = arith.constant 0 : index
    %32 = vector.load %arg6[%c0_14, %c0_15] : memref<32x384xbf16, #tpu.memory_space<vmem>>, vector<32x384xbf16>
    tpu.vector_store %arg6[%c0_14, %c0_15], %31 {strides = array<i32>} : memref<32x384xbf16, #tpu.memory_space<vmem>>, vector<32x384xbf16>,
    return
  }
  func.func @transform_0(%arg0: i32) -> (i32, i32) {
    %c0_i32 = arith.constant 0 : i32
    %c0_i32_0 = arith.constant 0 : i32
    return %arg0, %c0_i32 : i32, i32
  }
  func.func @transform_1(%arg0: i32) -> (i32, i32) {
    %c0_i32 = arith.constant 0 : i32
    %c0_i32_0 = arith.constant 0 : i32
    %c0_i32_1 = arith.constant 0 : i32
    return %c0_i32, %c0_i32_0 : i32, i32
  }
  func.func @transform_2(%arg0: i32) -> (i32, i32) {
    %c0_i32 = arith.constant 0 : i32
    %c0_i32_0 = arith.constant 0 : i32
    %c0_i32_1 = arith.constant 0 : i32
    return %c0_i32, %c0_i32_0 : i32, i32
  }
  func.func @transform_3(%arg0: i32) -> (i32, i32) {
    %c0_i32 = arith.constant 0 : i32
    %c0_i32_0 = arith.constant 0 : i32
    %c0_i32_1 = arith.constant 0 : i32
    return %c0_i32, %c0_i32_0 : i32, i32
  }
  func.func @transform_4(%arg0: i32) -> (i32, i32) {
    %c0_i32 = arith.constant 0 : i32
    %c0_i32_0 = arith.constant 0 : i32
    %c0_i32_1 = arith.constant 0 : i32
    return %c0_i32, %c0_i32_0 : i32, i32
  }
  func.func @transform_5(%arg0: i32) -> (i32, i32) {
    %c0_i32 = arith.constant 0 : i32
    %c0_i32_0 = arith.constant 0 : i32
    return %arg0, %c0_i32 : i32, i32
  }
}

module attributes {stable_mosaic.version = 11 : i64} {
  func.func @_layernorm_kernel(%arg0: i32, %arg1: memref<32x128xf32, #tpu.memory_space<vmem>>, %arg2: memref<1x128xf32, #tpu.memory_space<vmem>>, %arg3: memref<1x128xf32, #tpu.memory_space<vmem>>, %arg4: memref<32x128xf32, #tpu.memory_space<vmem>>) attributes {dimension_semantics = [#tpu.dimension_semantics<parallel>], iteration_bounds = array<i64: 1>, scalar_prefetch = 0 : i64, scratch_operands = 0 : i64, tpu.core_type = #tpu.core_type<tc>, window_params = [{transform_indices = @transform_0, window_bounds = array<i64: 32, 128>}, {pipeline_mode = #tpu.pipeline_mode<synchronous>, transform_indices = @transform_1, window_bounds = array<i64: 1, 128>}, {pipeline_mode = #tpu.pipeline_mode<synchronous>, transform_indices = @transform_2, window_bounds = array<i64: 1, 128>}, {transform_indices = @transform_3, window_bounds = array<i64: 32, 128>}]} {
    %c0 = arith.constant 0 : index
    %c0_0 = arith.constant 0 : index
    %0 = vector.load %arg1[%c0, %c0_0] : memref<32x128xf32, #tpu.memory_space<vmem>>, vector<32x128xf32>
    %c0_1 = arith.constant 0 : index
    %c0_2 = arith.constant 0 : index
    %1 = vector.load %arg2[%c0_1, %c0_2] : memref<1x128xf32, #tpu.memory_space<vmem>>, vector<1x128xf32>
    %c0_3 = arith.constant 0 : index
    %c0_4 = arith.constant 0 : index
    %2 = vector.load %arg3[%c0_3, %c0_4] : memref<1x128xf32, #tpu.memory_space<vmem>>, vector<1x128xf32>
    %cst = arith.constant dense<0.000000e+00> : vector<32xf32>
    %3 = vector.multi_reduction <add>, %0, %cst [1] : vector<32x128xf32> to vector<32xf32>
    %4 = vector.shape_cast %3 : vector<32xf32> to vector<32x1xf32>
    %cst_5 = arith.constant 1.280000e+02 : f32
    %5 = vector.broadcast %cst_5 : f32 to vector<32x1xf32>
    %6 = arith.divf %4, %5 : vector<32x1xf32>
    %7 = arith.mulf %0, %0 : vector<32x128xf32>
    %cst_6 = arith.constant dense<0.000000e+00> : vector<32xf32>
    %8 = vector.multi_reduction <add>, %7, %cst_6 [1] : vector<32x128xf32> to vector<32xf32>
    %9 = vector.shape_cast %8 : vector<32xf32> to vector<32x1xf32>
    %cst_7 = arith.constant 1.280000e+02 : f32
    %10 = vector.broadcast %cst_7 : f32 to vector<32x1xf32>
    %11 = arith.divf %9, %10 : vector<32x1xf32>
    %12 = arith.mulf %6, %6 : vector<32x1xf32>
    %13 = arith.subf %11, %12 : vector<32x1xf32>
    %14 = vector.broadcast %6 : vector<32x1xf32> to vector<32x128xf32>
    %15 = arith.subf %0, %14 : vector<32x128xf32>
    %cst_8 = arith.constant 9.99999974E-6 : f32
    %16 = vector.broadcast %cst_8 : f32 to vector<32x1xf32>
    %17 = arith.addf %13, %16 : vector<32x1xf32>
    %18 = math.rsqrt %17 : vector<32x1xf32>
    %19 = vector.broadcast %18 : vector<32x1xf32> to vector<32x128xf32>
    %20 = arith.mulf %15, %19 : vector<32x128xf32>
    %21 = vector.broadcast %1 : vector<1x128xf32> to vector<32x128xf32>
    %22 = arith.mulf %20, %21 : vector<32x128xf32>
    %23 = vector.broadcast %2 : vector<1x128xf32> to vector<32x128xf32>
    %24 = arith.addf %22, %23 : vector<32x128xf32>
    %c0_9 = arith.constant 0 : index
    %c0_10 = arith.constant 0 : index
    %25 = vector.load %arg4[%c0_9, %c0_10] : memref<32x128xf32, #tpu.memory_space<vmem>>, vector<32x128xf32>
    tpu.vector_store %arg4[%c0_9, %c0_10], %24 {strides = array<i32>} : memref<32x128xf32, #tpu.memory_space<vmem>>, vector<32x128xf32>,
    return
  }
  func.func @transform_0(%arg0: i32) -> (i32, i32) {
    %c0_i32 = arith.constant 0 : i32
    %c0_i32_0 = arith.constant 0 : i32
    return %arg0, %c0_i32 : i32, i32
  }
  func.func @transform_1(%arg0: i32) -> (i32, i32) {
    %c0_i32 = arith.constant 0 : i32
    %c0_i32_0 = arith.constant 0 : i32
    %c0_i32_1 = arith.constant 0 : i32
    return %c0_i32, %c0_i32_0 : i32, i32
  }
  func.func @transform_2(%arg0: i32) -> (i32, i32) {
    %c0_i32 = arith.constant 0 : i32
    %c0_i32_0 = arith.constant 0 : i32
    %c0_i32_1 = arith.constant 0 : i32
    return %c0_i32, %c0_i32_0 : i32, i32
  }
  func.func @transform_3(%arg0: i32) -> (i32, i32) {
    %c0_i32 = arith.constant 0 : i32
    %c0_i32_0 = arith.constant 0 : i32
    return %arg0, %c0_i32 : i32, i32
  }
}

module attributes {stable_mosaic.version = 11 : i64} {
  func.func @_ffn_kernel(%arg0: i32, %arg1: memref<32x128xf32, #tpu.memory_space<vmem>>, %arg2: memref<1x128xf32, #tpu.memory_space<vmem>>, %arg3: memref<1x128xf32, #tpu.memory_space<vmem>>, %arg4: memref<128x256xbf16, #tpu.memory_space<vmem>>, %arg5: memref<1x256xf32, #tpu.memory_space<vmem>>, %arg6: memref<256x128xbf16, #tpu.memory_space<vmem>>, %arg7: memref<1x128xf32, #tpu.memory_space<vmem>>, %arg8: memref<32x128xf32, #tpu.memory_space<vmem>>) attributes {dimension_semantics = [#tpu.dimension_semantics<parallel>], iteration_bounds = array<i64: 1>, scalar_prefetch = 0 : i64, scratch_operands = 0 : i64, tpu.core_type = #tpu.core_type<tc>, window_params = [{transform_indices = @transform_0, window_bounds = array<i64: 32, 128>}, {pipeline_mode = #tpu.pipeline_mode<synchronous>, transform_indices = @transform_1, window_bounds = array<i64: 1, 128>}, {pipeline_mode = #tpu.pipeline_mode<synchronous>, transform_indices = @transform_2, window_bounds = array<i64: 1, 128>}, {pipeline_mode = #tpu.pipeline_mode<synchronous>, transform_indices = @transform_3, window_bounds = array<i64: 128, 256>}, {pipeline_mode = #tpu.pipeline_mode<synchronous>, transform_indices = @transform_4, window_bounds = array<i64: 1, 256>}, {pipeline_mode = #tpu.pipeline_mode<synchronous>, transform_indices = @transform_5, window_bounds = array<i64: 256, 128>}, {pipeline_mode = #tpu.pipeline_mode<synchronous>, transform_indices = @transform_6, window_bounds = array<i64: 1, 128>}, {transform_indices = @transform_7, window_bounds = array<i64: 32, 128>}]} {
    %c0 = arith.constant 0 : index
    %c0_0 = arith.constant 0 : index
    %0 = vector.load %arg1[%c0, %c0_0] : memref<32x128xf32, #tpu.memory_space<vmem>>, vector<32x128xf32>
    %c0_1 = arith.constant 0 : index
    %c0_2 = arith.constant 0 : index
    %1 = vector.load %arg2[%c0_1, %c0_2] : memref<1x128xf32, #tpu.memory_space<vmem>>, vector<1x128xf32>
    %c0_3 = arith.constant 0 : index
    %c0_4 = arith.constant 0 : index
    %2 = vector.load %arg3[%c0_3, %c0_4] : memref<1x128xf32, #tpu.memory_space<vmem>>, vector<1x128xf32>
    %cst = arith.constant dense<0.000000e+00> : vector<32xf32>
    %3 = vector.multi_reduction <add>, %0, %cst [1] : vector<32x128xf32> to vector<32xf32>
    %4 = vector.shape_cast %3 : vector<32xf32> to vector<32x1xf32>
    %cst_5 = arith.constant 1.280000e+02 : f32
    %5 = vector.broadcast %cst_5 : f32 to vector<32x1xf32>
    %6 = arith.divf %4, %5 : vector<32x1xf32>
    %7 = arith.mulf %0, %0 : vector<32x128xf32>
    %cst_6 = arith.constant dense<0.000000e+00> : vector<32xf32>
    %8 = vector.multi_reduction <add>, %7, %cst_6 [1] : vector<32x128xf32> to vector<32xf32>
    %9 = vector.shape_cast %8 : vector<32xf32> to vector<32x1xf32>
    %cst_7 = arith.constant 1.280000e+02 : f32
    %10 = vector.broadcast %cst_7 : f32 to vector<32x1xf32>
    %11 = arith.divf %9, %10 : vector<32x1xf32>
    %12 = arith.mulf %6, %6 : vector<32x1xf32>
    %13 = arith.subf %11, %12 : vector<32x1xf32>
    %14 = vector.broadcast %6 : vector<32x1xf32> to vector<32x128xf32>
    %15 = arith.subf %0, %14 : vector<32x128xf32>
    %cst_8 = arith.constant 9.99999974E-6 : f32
    %16 = vector.broadcast %cst_8 : f32 to vector<32x1xf32>
    %17 = arith.addf %13, %16 : vector<32x1xf32>
    %18 = math.rsqrt %17 : vector<32x1xf32>
    %19 = vector.broadcast %18 : vector<32x1xf32> to vector<32x128xf32>
    %20 = arith.mulf %15, %19 : vector<32x128xf32>
    %21 = vector.broadcast %1 : vector<1x128xf32> to vector<32x128xf32>
    %22 = arith.mulf %20, %21 : vector<32x128xf32>
    %23 = vector.broadcast %2 : vector<1x128xf32> to vector<32x128xf32>
    %24 = arith.addf %22, %23 : vector<32x128xf32>
    %25 = arith.truncf %24 : vector<32x128xf32> to vector<32x128xbf16>
    %c0_9 = arith.constant 0 : index
    %c0_10 = arith.constant 0 : index
    %26 = vector.load %arg4[%c0_9, %c0_10] : memref<128x256xbf16, #tpu.memory_space<vmem>>, vector<128x256xbf16>
    %cst_11 = arith.constant dense<0.000000e+00> : vector<32x256xf32>
    %27 = tpu.matmul %25, %26, %cst_11 {dimension_numbers = #tpu.dot_dimension_numbers<[1], [0], [0], [1], [0, 0, 1, 1], [], []>} : vector<32x128xbf16>, vector<128x256xbf16>, vector<32x256xf32> -> vector<32x256xf32>
    %c0_12 = arith.constant 0 : index
    %c0_13 = arith.constant 0 : index
    %28 = vector.load %arg5[%c0_12, %c0_13] : memref<1x256xf32, #tpu.memory_space<vmem>>, vector<1x256xf32>
    %29 = vector.broadcast %28 : vector<1x256xf32> to vector<32x256xf32>
    %30 = arith.addf %27, %29 : vector<32x256xf32>
    %cst_14 = arith.constant 0.000000e+00 : f32
    %31 = vector.broadcast %cst_14 : f32 to vector<32x256xf32>
    %32 = arith.maximumf %30, %31 : vector<32x256xf32>
    %33 = arith.truncf %32 : vector<32x256xf32> to vector<32x256xbf16>
    %c0_15 = arith.constant 0 : index
    %c0_16 = arith.constant 0 : index
    %34 = vector.load %arg6[%c0_15, %c0_16] : memref<256x128xbf16, #tpu.memory_space<vmem>>, vector<256x128xbf16>
    %cst_17 = arith.constant dense<0.000000e+00> : vector<32x128xf32>
    %35 = tpu.matmul %33, %34, %cst_17 {dimension_numbers = #tpu.dot_dimension_numbers<[1], [0], [0], [1], [0, 0, 1, 1], [], []>} : vector<32x256xbf16>, vector<256x128xbf16>, vector<32x128xf32> -> vector<32x128xf32>
    %c0_18 = arith.constant 0 : index
    %c0_19 = arith.constant 0 : index
    %36 = vector.load %arg7[%c0_18, %c0_19] : memref<1x128xf32, #tpu.memory_space<vmem>>, vector<1x128xf32>
    %37 = vector.broadcast %36 : vector<1x128xf32> to vector<32x128xf32>
    %38 = arith.addf %35, %37 : vector<32x128xf32>
    %39 = arith.addf %0, %38 : vector<32x128xf32>
    %c0_20 = arith.constant 0 : index
    %c0_21 = arith.constant 0 : index
    %40 = vector.load %arg8[%c0_20, %c0_21] : memref<32x128xf32, #tpu.memory_space<vmem>>, vector<32x128xf32>
    tpu.vector_store %arg8[%c0_20, %c0_21], %39 {strides = array<i32>} : memref<32x128xf32, #tpu.memory_space<vmem>>, vector<32x128xf32>,
    return
  }
  func.func @transform_0(%arg0: i32) -> (i32, i32) {
    %c0_i32 = arith.constant 0 : i32
    %c0_i32_0 = arith.constant 0 : i32
    return %arg0, %c0_i32 : i32, i32
  }
  func.func @transform_1(%arg0: i32) -> (i32, i32) {
    %c0_i32 = arith.constant 0 : i32
    %c0_i32_0 = arith.constant 0 : i32
    %c0_i32_1 = arith.constant 0 : i32
    return %c0_i32, %c0_i32_0 : i32, i32
  }
  func.func @transform_2(%arg0: i32) -> (i32, i32) {
    %c0_i32 = arith.constant 0 : i32
    %c0_i32_0 = arith.constant 0 : i32
    %c0_i32_1 = arith.constant 0 : i32
    return %c0_i32, %c0_i32_0 : i32, i32
  }
  func.func @transform_3(%arg0: i32) -> (i32, i32) {
    %c0_i32 = arith.constant 0 : i32
    %c0_i32_0 = arith.constant 0 : i32
    %c0_i32_1 = arith.constant 0 : i32
    return %c0_i32, %c0_i32_0 : i32, i32
  }
  func.func @transform_4(%arg0: i32) -> (i32, i32) {
    %c0_i32 = arith.constant 0 : i32
    %c0_i32_0 = arith.constant 0 : i32
    %c0_i32_1 = arith.constant 0 : i32
    return %c0_i32, %c0_i32_0 : i32, i32
  }
  func.func @transform_5(%arg0: i32) -> (i32, i32) {
    %c0_i32 = arith.constant 0 : i32
    %c0_i32_0 = arith.constant 0 : i32
    %c0_i32_1 = arith.constant 0 : i32
    return %c0_i32, %c0_i32_0 : i32, i32
  }
  func.func @transform_6(%arg0: i32) -> (i32, i32) {
    %c0_i32 = arith.constant 0 : i32
    %c0_i32_0 = arith.constant 0 : i32
    %c0_i32_1 = arith.constant 0 : i32
    return %c0_i32, %c0_i32_0 : i32, i32
  }
  func.func @transform_7(%arg0: i32) -> (i32, i32) {
    %c0_i32 = arith.constant 0 : i32
    %c0_i32_0 = arith.constant 0 : i32
    return %arg0, %c0_i32 : i32, i32
  }
}

module attributes {stable_mosaic.version = 11 : i64} {
  func.func @_flash_attn_kernel(%arg0: i32, %arg1: i32, %arg2: i32, %arg3: i32, %arg4: memref<1x1x16x32xbf16, #tpu.memory_space<vmem>>, %arg5: memref<1x1x16x32xbf16, #tpu.memory_space<vmem>>, %arg6: memref<1x1x16x32xbf16, #tpu.memory_space<vmem>>, %arg7: memref<1x1x16xf32, #tpu.memory_space<vmem>>, %arg8: memref<128x128xbf16, #tpu.memory_space<vmem>>, %arg9: memref<1x128xf32, #tpu.memory_space<vmem>>, %arg10: memref<1x16x128xf32, #tpu.memory_space<vmem>>, %arg11: memref<1x16x128xf32, #tpu.memory_space<vmem>>, %arg12: memref<16x1xf32, #tpu.memory_space<vmem>>, %arg13: memref<16x1xf32, #tpu.memory_space<vmem>>, %arg14: memref<16x32xf32, #tpu.memory_space<vmem>>, %arg15: memref<16x128xf32, #tpu.memory_space<vmem>>) attributes {dimension_semantics = [#tpu.dimension_semantics<parallel>, #tpu.dimension_semantics<parallel>, #tpu.dimension_semantics<arbitrary>, #tpu.dimension_semantics<arbitrary>], iteration_bounds = array<i64: 2, 1, 4, 1>, scalar_prefetch = 0 : i64, scratch_operands = 4 : i64, tpu.core_type = #tpu.core_type<tc>, window_params = [{transform_indices = @transform_0, window_bounds = array<i64: 1, 1, 16, 32>}, {transform_indices = @transform_1, window_bounds = array<i64: 1, 1, 16, 32>}, {transform_indices = @transform_2, window_bounds = array<i64: 1, 1, 16, 32>}, {transform_indices = @transform_3, window_bounds = array<i64: 1, 1, 16>}, {pipeline_mode = #tpu.pipeline_mode<synchronous>, transform_indices = @transform_4, window_bounds = array<i64: 128, 128>}, {pipeline_mode = #tpu.pipeline_mode<synchronous>, transform_indices = @transform_5, window_bounds = array<i64: 1, 128>}, {transform_indices = @transform_6, window_bounds = array<i64: 1, 16, 128>}, {transform_indices = @transform_7, window_bounds = array<i64: 1, 16, 128>}]} {
    %c0_i32 = arith.constant 0 : i32
    %0 = arith.cmpi eq, %arg2, %c0_i32 : i32
    %c0_i32_0 = arith.constant 0 : i32
    %1 = arith.cmpi eq, %arg3, %c0_i32_0 : i32
    %2 = arith.andi %0, %1 : i1
    %3 = arith.extui %2 : i1 to i32
    %c0_i32_1 = arith.constant 0 : i32
    %4 = arith.cmpi ne, %3, %c0_i32_1 : i32
    scf.if %4 {
      %cst_37 = arith.constant 0.000000e+00 : f32
      %50 = vector.broadcast %cst_37 : f32 to vector<16x128xf32>
      %c0_38 = arith.constant 0 : index
      %c0_39 = arith.constant 0 : index
      %51 = vector.load %arg15[%c0_38, %c0_39] : memref<16x128xf32, #tpu.memory_space<vmem>>, vector<16x128xf32>
      tpu.vector_store %arg15[%c0_38, %c0_39], %50 {strides = array<i32>} : memref<16x128xf32, #tpu.memory_space<vmem>>, vector<16x128xf32>,
    } else {
    }
    %c0_i32_2 = arith.constant 0 : i32
    %5 = arith.cmpi eq, %arg3, %c0_i32_2 : i32
    %6 = arith.extui %5 : i1 to i32
    %c0_i32_3 = arith.constant 0 : i32
    %7 = arith.cmpi ne, %6, %c0_i32_3 : i32
    scf.if %7 {
      %cst_37 = arith.constant 0xFF800000 : f32
      %50 = vector.broadcast %cst_37 : f32 to vector<16x1xf32>
      %c0_38 = arith.constant 0 : index
      %c0_39 = arith.constant 0 : index
      %51 = vector.load %arg12[%c0_38, %c0_39] : memref<16x1xf32, #tpu.memory_space<vmem>>, vector<16x1xf32>
      tpu.vector_store %arg12[%c0_38, %c0_39], %50 {strides = array<i32>} : memref<16x1xf32, #tpu.memory_space<vmem>>, vector<16x1xf32>,
      %cst_40 = arith.constant 0.000000e+00 : f32
      %52 = vector.broadcast %cst_40 : f32 to vector<16x1xf32>
      %c0_41 = arith.constant 0 : index
      %c0_42 = arith.constant 0 : index
      %53 = vector.load %arg13[%c0_41, %c0_42] : memref<16x1xf32, #tpu.memory_space<vmem>>, vector<16x1xf32>
      tpu.vector_store %arg13[%c0_41, %c0_42], %52 {strides = array<i32>} : memref<16x1xf32, #tpu.memory_space<vmem>>, vector<16x1xf32>,
      %cst_43 = arith.constant 0.000000e+00 : f32
      %54 = vector.broadcast %cst_43 : f32 to vector<16x32xf32>
      %c0_44 = arith.constant 0 : index
      %c0_45 = arith.constant 0 : index
      %55 = vector.load %arg14[%c0_44, %c0_45] : memref<16x32xf32, #tpu.memory_space<vmem>>, vector<16x32xf32>
      tpu.vector_store %arg14[%c0_44, %c0_45], %54 {strides = array<i32>} : memref<16x32xf32, #tpu.memory_space<vmem>>, vector<16x32xf32>,
    } else {
    }
    %c0 = arith.constant 0 : index
    %c0_4 = arith.constant 0 : index
    %c0_5 = arith.constant 0 : index
    %c0_6 = arith.constant 0 : index
    %8 = vector.load %arg4[%c0, %c0_4, %c0_5, %c0_6] : memref<1x1x16x32xbf16, #tpu.memory_space<vmem>>, vector<1x1x16x32xbf16>
    %9 = vector.shape_cast %8 : vector<1x1x16x32xbf16> to vector<16x32xbf16>
    %c0_7 = arith.constant 0 : index
    %c0_8 = arith.constant 0 : index
    %c0_9 = arith.constant 0 : index
    %c0_10 = arith.constant 0 : index
    %10 = vector.load %arg5[%c0_7, %c0_8, %c0_9, %c0_10] : memref<1x1x16x32xbf16, #tpu.memory_space<vmem>>, vector<1x1x16x32xbf16>
    %11 = vector.shape_cast %10 : vector<1x1x16x32xbf16> to vector<16x32xbf16>
    %cst = arith.constant dense<0.000000e+00> : vector<16x16xf32>
    %12 = tpu.matmul %9, %11, %cst {dimension_numbers = #tpu.dot_dimension_numbers<[1], [1], [0], [0], [0, 0, 1, 0], [], []>} : vector<16x32xbf16>, vector<16x32xbf16>, vector<16x16xf32> -> vector<16x16xf32>
    %c0_11 = arith.constant 0 : index
    %c0_12 = arith.constant 0 : index
    %c0_13 = arith.constant 0 : index
    %13 = vector.load %arg7[%c0_11, %c0_12, %c0_13] : memref<1x1x16xf32, #tpu.memory_space<vmem>>, vector<1x1x16xf32>
    %14 = vector.shape_cast %13 : vector<1x1x16xf32> to vector<1x16xf32>
    %15 = vector.broadcast %14 : vector<1x16xf32> to vector<16x16xf32>
    %16 = arith.addf %12, %15 : vector<16x16xf32>
    %c0_14 = arith.constant 0 : index
    %c0_15 = arith.constant 0 : index
    %17 = vector.load %arg12[%c0_14, %c0_15] : memref<16x1xf32, #tpu.memory_space<vmem>>, vector<16x1xf32>
    %cst_16 = arith.constant dense<0xFF800000> : vector<16xf32>
    %18 = vector.multi_reduction <maximumf>, %16, %cst_16 [1] : vector<16x16xf32> to vector<16xf32>
    %19 = vector.shape_cast %18 : vector<16xf32> to vector<16x1xf32>
    %20 = arith.maximumf %17, %19 : vector<16x1xf32>
    %21 = arith.subf %17, %20 : vector<16x1xf32>
    %22 = math.exp %21 : vector<16x1xf32>
    %23 = vector.broadcast %20 : vector<16x1xf32> to vector<16x16xf32>
    %24 = arith.subf %16, %23 : vector<16x16xf32>
    %25 = math.exp %24 : vector<16x16xf32>
    %c0_17 = arith.constant 0 : index
    %c0_18 = arith.constant 0 : index
    %26 = vector.load %arg13[%c0_17, %c0_18] : memref<16x1xf32, #tpu.memory_space<vmem>>, vector<16x1xf32>
    %27 = arith.mulf %22, %26 : vector<16x1xf32>
    %cst_19 = arith.constant dense<0.000000e+00> : vector<16xf32>
    %28 = vector.multi_reduction <add>, %25, %cst_19 [1] : vector<16x16xf32> to vector<16xf32>
    %29 = vector.shape_cast %28 : vector<16xf32> to vector<16x1xf32>
    %30 = arith.addf %27, %29 : vector<16x1xf32>
    %c0_20 = arith.constant 0 : index
    %c0_21 = arith.constant 0 : index
    %31 = vector.load %arg13[%c0_20, %c0_21] : memref<16x1xf32, #tpu.memory_space<vmem>>, vector<16x1xf32>
    tpu.vector_store %arg13[%c0_20, %c0_21], %30 {strides = array<i32>} : memref<16x1xf32, #tpu.memory_space<vmem>>, vector<16x1xf32>,
    %c0_22 = arith.constant 0 : index
    %c0_23 = arith.constant 0 : index
    %32 = vector.load %arg14[%c0_22, %c0_23] : memref<16x32xf32, #tpu.memory_space<vmem>>, vector<16x32xf32>
    %33 = vector.broadcast %22 : vector<16x1xf32> to vector<16x32xf32>
    %34 = arith.mulf %33, %32 : vector<16x32xf32>
    %35 = arith.truncf %25 : vector<16x16xf32> to vector<16x16xbf16>
    %c0_24 = arith.constant 0 : index
    %c0_25 = arith.constant 0 : index
    %c0_26 = arith.constant 0 : index
    %c0_27 = arith.constant 0 : index
    %36 = vector.load %arg6[%c0_24, %c0_25, %c0_26, %c0_27] : memref<1x1x16x32xbf16, #tpu.memory_space<vmem>>, vector<1x1x16x32xbf16>
    %37 = vector.shape_cast %36 : vector<1x1x16x32xbf16> to vector<16x32xbf16>
    %cst_28 = arith.constant dense<0.000000e+00> : vector<16x32xf32>
    %38 = tpu.matmul %35, %37, %cst_28 {dimension_numbers = #tpu.dot_dimension_numbers<[1], [0], [0], [1], [0, 0, 1, 1], [], []>} : vector<16x16xbf16>, vector<16x32xbf16>, vector<16x32xf32> -> vector<16x32xf32>
    %39 = arith.addf %34, %38 : vector<16x32xf32>
    %c0_29 = arith.constant 0 : index
    %c0_30 = arith.constant 0 : index
    %40 = vector.load %arg14[%c0_29, %c0_30] : memref<16x32xf32, #tpu.memory_space<vmem>>, vector<16x32xf32>
    tpu.vector_store %arg14[%c0_29, %c0_30], %39 {strides = array<i32>} : memref<16x32xf32, #tpu.memory_space<vmem>>, vector<16x32xf32>,
    %c0_31 = arith.constant 0 : index
    %c0_32 = arith.constant 0 : index
    %41 = vector.load %arg12[%c0_31, %c0_32] : memref<16x1xf32, #tpu.memory_space<vmem>>, vector<16x1xf32>
    tpu.vector_store %arg12[%c0_31, %c0_32], %20 {strides = array<i32>} : memref<16x1xf32, #tpu.memory_space<vmem>>, vector<16x1xf32>,
    %c0_i32_33 = arith.constant 0 : i32
    %42 = arith.cmpi eq, %arg3, %c0_i32_33 : i32
    %43 = arith.extui %42 : i1 to i32
    %c0_i32_34 = arith.constant 0 : i32
    %44 = arith.cmpi ne, %43, %c0_i32_34 : i32
    scf.if %44 {
      %c0_37 = arith.constant 0 : index
      %c0_38 = arith.constant 0 : index
      %50 = vector.load %arg14[%c0_37, %c0_38] : memref<16x32xf32, #tpu.memory_space<vmem>>, vector<16x32xf32>
      %c0_39 = arith.constant 0 : index
      %c0_40 = arith.constant 0 : index
      %51 = vector.load %arg13[%c0_39, %c0_40] : memref<16x1xf32, #tpu.memory_space<vmem>>, vector<16x1xf32>
      %52 = tpu.reciprocal %51 {approx = true} : vector<16x1xf32> -> vector<16x1xf32>
      %53 = vector.broadcast %52 : vector<16x1xf32> to vector<16x32xf32>
      %54 = arith.mulf %50, %53 : vector<16x32xf32>
      %c32_i32 = arith.constant 32 : i32
      %55 = arith.muli %arg2, %c32_i32 : i32
      %56 = tpu.assume_multiple %55, 32 : i32
      %57 = arith.index_cast %56 : i32 to index
      %c0_41 = arith.constant 0 : index
      %58 = vector.load %arg8[%57, %c0_41] : memref<128x128xbf16, #tpu.memory_space<vmem>>, vector<32x128xbf16>
      %c0_42 = arith.constant 0 : index
      %c0_43 = arith.constant 0 : index
      %59 = vector.load %arg15[%c0_42, %c0_43] : memref<16x128xf32, #tpu.memory_space<vmem>>, vector<16x128xf32>
      %60 = arith.truncf %54 : vector<16x32xf32> to vector<16x32xbf16>
      %cst_44 = arith.constant dense<0.000000e+00> : vector<16x128xf32>
      %61 = tpu.matmul %60, %58, %cst_44 {dimension_numbers = #tpu.dot_dimension_numbers<[1], [0], [0], [1], [0, 0, 1, 1], [], []>} : vector<16x32xbf16>, vector<32x128xbf16>, vector<16x128xf32> -> vector<16x128xf32>
      %62 = arith.addf %59, %61 : vector<16x128xf32>
      %c0_45 = arith.constant 0 : index
      %c0_46 = arith.constant 0 : index
      %63 = vector.load %arg15[%c0_45, %c0_46] : memref<16x128xf32, #tpu.memory_space<vmem>>, vector<16x128xf32>
      tpu.vector_store %arg15[%c0_45, %c0_46], %62 {strides = array<i32>} : memref<16x128xf32, #tpu.memory_space<vmem>>, vector<16x128xf32>,
    } else {
    }
    %c3_i32 = arith.constant 3 : i32
    %45 = arith.cmpi eq, %arg2, %c3_i32 : i32
    %c0_i32_35 = arith.constant 0 : i32
    %46 = arith.cmpi eq, %arg3, %c0_i32_35 : i32
    %47 = arith.andi %45, %46 : i1
    %48 = arith.extui %47 : i1 to i32
    %c0_i32_36 = arith.constant 0 : i32
    %49 = arith.cmpi ne, %48, %c0_i32_36 : i32
    scf.if %49 {
      %c0_37 = arith.constant 0 : index
      %c0_38 = arith.constant 0 : index
      %c0_39 = arith.constant 0 : index
      %50 = vector.load %arg10[%c0_37, %c0_38, %c0_39] : memref<1x16x128xf32, #tpu.memory_space<vmem>>, vector<1x16x128xf32>
      %51 = vector.shape_cast %50 : vector<1x16x128xf32> to vector<16x128xf32>
      %c0_40 = arith.constant 0 : index
      %c0_41 = arith.constant 0 : index
      %52 = vector.load %arg15[%c0_40, %c0_41] : memref<16x128xf32, #tpu.memory_space<vmem>>, vector<16x128xf32>
      %53 = arith.addf %51, %52 : vector<16x128xf32>
      %c0_42 = arith.constant 0 : index
      %c0_43 = arith.constant 0 : index
      %54 = vector.load %arg9[%c0_42, %c0_43] : memref<1x128xf32, #tpu.memory_space<vmem>>, vector<1x128xf32>
      %55 = vector.broadcast %54 : vector<1x128xf32> to vector<16x128xf32>
      %56 = arith.addf %53, %55 : vector<16x128xf32>
      %c0_44 = arith.constant 0 : index
      %c0_45 = arith.constant 0 : index
      %c0_46 = arith.constant 0 : index
      %57 = vector.load %arg11[%c0_44, %c0_45, %c0_46] : memref<1x16x128xf32, #tpu.memory_space<vmem>>, vector<1x16x128xf32>
      %58 = vector.shape_cast %57 : vector<1x16x128xf32> to vector<16x128xf32>
      %59 = vector.shape_cast %56 : vector<16x128xf32> to vector<1x16x128xf32>
      tpu.vector_store %arg11[%c0_44, %c0_45, %c0_46], %59 {strides = array<i32>} : memref<1x16x128xf32, #tpu.memory_space<vmem>>, vector<1x16x128xf32>,
    } else {
    }
    return
  }
  func.func @transform_0(%arg0: i32, %arg1: i32, %arg2: i32, %arg3: i32) -> (i32, i32, i32, i32) {
    %c0_i32 = arith.constant 0 : i32
    %c0_i32_0 = arith.constant 0 : i32
    return %arg0, %arg2, %arg1, %c0_i32 : i32, i32, i32, i32
  }
  func.func @transform_1(%arg0: i32, %arg1: i32, %arg2: i32, %arg3: i32) -> (i32, i32, i32, i32) {
    %c0_i32 = arith.constant 0 : i32
    %c0_i32_0 = arith.constant 0 : i32
    return %arg0, %arg2, %arg3, %c0_i32 : i32, i32, i32, i32
  }
  func.func @transform_2(%arg0: i32, %arg1: i32, %arg2: i32, %arg3: i32) -> (i32, i32, i32, i32) {
    %c0_i32 = arith.constant 0 : i32
    %c0_i32_0 = arith.constant 0 : i32
    return %arg0, %arg2, %arg3, %c0_i32 : i32, i32, i32, i32
  }
  func.func @transform_3(%arg0: i32, %arg1: i32, %arg2: i32, %arg3: i32) -> (i32, i32, i32) {
    %c0_i32 = arith.constant 0 : i32
    %c0_i32_0 = arith.constant 0 : i32
    return %arg0, %c0_i32, %arg3 : i32, i32, i32
  }
  func.func @transform_4(%arg0: i32, %arg1: i32, %arg2: i32, %arg3: i32) -> (i32, i32) {
    %c0_i32 = arith.constant 0 : i32
    %c0_i32_0 = arith.constant 0 : i32
    %c0_i32_1 = arith.constant 0 : i32
    return %c0_i32, %c0_i32_0 : i32, i32
  }
  func.func @transform_5(%arg0: i32, %arg1: i32, %arg2: i32, %arg3: i32) -> (i32, i32) {
    %c0_i32 = arith.constant 0 : i32
    %c0_i32_0 = arith.constant 0 : i32
    %c0_i32_1 = arith.constant 0 : i32
    return %c0_i32, %c0_i32_0 : i32, i32
  }
  func.func @transform_6(%arg0: i32, %arg1: i32, %arg2: i32, %arg3: i32) -> (i32, i32, i32) {
    %c0_i32 = arith.constant 0 : i32
    %c0_i32_0 = arith.constant 0 : i32
    return %arg0, %arg1, %c0_i32 : i32, i32, i32
  }
  func.func @transform_7(%arg0: i32, %arg1: i32, %arg2: i32, %arg3: i32) -> (i32, i32, i32) {
    %c0_i32 = arith.constant 0 : i32
    %c0_i32_0 = arith.constant 0 : i32
    return %arg0, %arg1, %c0_i32 : i32, i32, i32
  }
}

</mosaic_0001>

<bundles_post_ra>
// kernel: transformer_encoder.8
= control target key start
LH: loop header
LB: loop body
LE: loop exit
PB: predicated region body
PF: predicated region fallthrough
CT: control target
= control target key end

     0   :  { %s394_s9 = smov 0   ;;  %s396_s10 = smov 0   ;;  %s421_s0 = inlined_call_operand.vmem [shape: f32[2,16,128], index: 0, kind: input, shape index: {}]   ;;  %s422_s1 = inlined_call_operand.vmem [shape: f32[16,128], index: 1, kind: input, shape index: {}]   ;;  %s423_s2 = inlined_call_operand.vmem [shape: f32[2,16,128], index: 2, kind: output, shape index: {}]  }
   0x1   :  { %s398_s11 = smov 0  }
   0x2 LB: > { %s24_s12 = sadd.s32 1, %s373_s10  ;;  %p322_p0 = scmp.ge.s32.totalorder %s377_s11, 1  ;;  %s377_s11 = sphi %s398_s11, %s12_s11   ;;  %s373_s10 = sphi %s396_s10, %s425_s10   ;;  %s369_s9 = sphi %s394_s9, %s424_s9  }
   0x3   : > { %p26_p1 = scmp.ge.s32.totalorder %s24_s12, 2  ;;  %p144_p2 = scmp.lt.s32.totalorder %s377_s11, 3 }
   0x5   : > { %s427_s12 = smov (%p26_p1, %s24_s12), 0  ;;  %p145_p3 = pnand %p322_p0, %p144_p2 }
   0x6   : > { %p180_p4 = scmp.lt.s32.totalorder (!%p145_p3), %s369_s9, 1  ;;  %v209_v0 = vld [vmem:[%s422_s1] sm:$0xff] (!%p145_p3)  ;;  %v210_v3 = vld [vmem:[%s422_s1 + $0x8] sm:$0xff] (!%p145_p3) }
   0x7   : > { %148 = sbr.rel (%p145_p3) target bundleno = 23 (0x17), region = 28 }
   0xe   : > { %s429_s9 = smov (!%p180_p4, %s369_s9), 1 }
   0xf   : > { %s329_s13 = sshll.u32 %s429_s9, 4 }
  0x10   : > { %s187_s16 = scalar_lea.vmem %s421_s0, %s329_s13  ;;  %s203_s23 = scalar_lea.vmem %s423_s2, %s329_s13 }
  0x11   : > { %v205_v1 = vld [vmem:[%s187_s16] sm:$0xff]  ;;  %v206_v2 = vld [vmem:[%s187_s16 + $0x8] sm:$0xff] }
  0x12   : > { %v207_v4 = vmul.f32 11.313708, %v205_v1  ;;  %v208_v5 = vmul.f32 11.313708, %v206_v2 }
  0x14   : > { %v211_v6 = vadd.f32 %v209_v0, %v207_v4  ;;  %v212_v7 = vadd.f32 %v210_v3, %v208_v5 }
  0x16   : > { %213 = vst [vmem:[%s203_s23] sm:$0xff] %v211_v6  ;;  %214 = vst [vmem:[%s203_s23 + $0x8] sm:$0xff] %v212_v7 }
  0x17 PF: > { %s12_s11 = sadd.s32 1, %s377_s11   ;;  %s424_s9 = smov %s373_s10 }
  0x18   : > { %p9_p5 = scmp.ge.s32.totalorder %s12_s11, 4   ;;  %s425_s10 = smov %s427_s12 }
  0x1a   :  { %11 = sbr.rel (!%p9_p5) target bundleno = 2 (0x2), region = 61 }

// kernel: transformer_encoder.9
= control target key start
LH: loop header
LB: loop body
LE: loop exit
PB: predicated region body
PF: predicated region fallthrough
CT: control target
= control target key end

     0   :  { %v546_v29 = vmov 0   ;;  %s720_s0 = inlined_call_operand.vmem [shape: f32[32,128], index: 0, kind: input, shape index: {}]   ;;  %s721_s3 = inlined_call_operand.vmem [shape: bf16[128,384], index: 3, kind: input, shape index: {}]   ;;  %s722_s1 = inlined_call_operand.vmem [shape: f32[1,128], index: 1, kind: input, shape index: {}]   ;;  %s723_s2 = inlined_call_operand.vmem [shape: f32[1,128], index: 2, kind: input, shape index: {}]   ;;  %s724_s4 = inlined_call_operand.vmem [shape: f32[1,384], index: 4, kind: input, shape index: {}]   ;;  %s725_s5 = inlined_call_operand.vmem [shape: bf16[32,384], index: 5, kind: output, shape index: {}]  }
   0x1   :  { %v580_v0 = vld [vmem:[%s720_s0] sm:$0xff]  ;;  %v585_v1 = vld [vmem:[%s720_s0 + $0x8] sm:$0xff]  ;;  %v598_v5 = vld [vmem:[%s720_s0 + $0x10] sm:$0xff]  ;;  %311 = vmatprep.mubr.bf16.mxu0 %v546_v29 }
   0x2   :  { %27 = vadd.xlane.f32.xlu0 %v580_v0  ;;  %v40_v2 = vmul.f32 %v580_v0, %v580_v0  ;;  %v506_v3 = vld [vmem:[%s721_s3 + $0x4] ss:$12 sps:$4 sm:$0xff]   ;;  %v41_v4 = vmul.f32 %v585_v1, %v585_v1  ;;  %v604_v6 = vld [vmem:[%s720_s0 + $0x18] sm:$0xff]  ;;  %v42_v7 = vmul.f32 %v598_v5, %v598_v5  ;;  %v508_v9 = vld [vmem:[%s721_s3] ss:$12 sps:$4 sm:$0xff]  }
   0x3   :  { %279 = vmatprep.subr.bf16.mxu0 %v506_v3  ;;  %v43_v8 = vmul.f32 %v604_v6, %v604_v6  ;;  %v509_v10 = vld [vmem:[%s721_s3 + $0x1c] ss:$12 sps:$4 sm:$0xff]   ;;  %v511_v11 = vld [vmem:[%s721_s3 + $0x18] ss:$12 sps:$4 sm:$0xff]   ;;  %v512_v12 = vld [vmem:[%s721_s3 + $0x34] ss:$12 sps:$4 sm:$0xff]  }
   0x4   :  { %44 = vadd.xlane.f32.xlu1 %v40_v2  ;;  %280 = vmatpush1.bf16.msra.mxu0 %v508_v9  ;;  %v514_v13 = vld [vmem:[%s721_s3 + $0x8] ss:$12 sps:$4 sm:$0xff]   ;;  %v515_v14 = vld [vmem:[%s721_s3 + $0x30] ss:$12 sps:$4 sm:$0xff]   ;;  %v516_v15 = vld [vmem:[%s721_s3 + $0x4c] ss:$12 sps:$4 sm:$0xff]  }
   0x5   :  { %281 = vmatprep.subr.bf16.mxu0 %v509_v10  ;;  %485 = vmatprep.subr.bf16.mxu1 %v514_v13  ;;  %v518_v16 = vld [vmem:[%s721_s3 + $0x20] ss:$12 sps:$4 sm:$0xff]   ;;  %v519_v17 = vld [vmem:[%s721_s3 + $0x48] ss:$12 sps:$4 sm:$0xff]   ;;  %v520_v18 = vld [vmem:[%s721_s3 + $0x64] ss:$12 sps:$4 sm:$0xff]  }
   0x6   :  { %29 = vadd.xlane.f32.xlu0 %v585_v1  ;;  %486 = vmatpush3.bf16.msra.mxu1 %v514_v13  ;;  %v522_v19 = vld [vmem:[%s721_s3 + $0x38] ss:$12 sps:$4 sm:$0xff]   ;;  %v523_v20 = vld [vmem:[%s721_s3 + $0x60] ss:$12 sps:$4 sm:$0xff]   ;;  %v524_v21 = vld [vmem:[%s721_s3 + $0x7c] ss:$12 sps:$4 sm:$0xff]  }
   0x7   :  { %487 = vmatprep.subr.bf16.mxu1 %v518_v16  ;;  %v526_v22 = vld [vmem:[%s721_s3 + $0x50] ss:$12 sps:$4 sm:$0xff]   ;;  %v527_v23 = vld [vmem:[%s721_s3 + $0x78] ss:$12 sps:$4 sm:$0xff]   ;;  %v528_v24 = vld [vmem:[%s721_s3 + $0x94] ss:$12 sps:$4 sm:$0xff]  }
   0x8   :  { %46 = vadd.xlane.f32.xlu1 %v41_v4  ;;  %282 = vmatpush1.bf16.msra.mxu0 %v511_v11  ;;  %v530_v25 = vld [vmem:[%s721_s3 + $0x68] ss:$12 sps:$4 sm:$0xff]   ;;  %v531_v26 = vld [vmem:[%s721_s3 + $0x90] ss:$12 sps:$4 sm:$0xff]   ;;  %v532_v27 = vld [vmem:[%s721_s3 + $0xac] ss:$12 sps:$4 sm:$0xff]  }
   0x9   :  { %283 = vmatprep.subr.bf16.mxu0 %v512_v12  ;;  %v534_v28 = vld [vmem:[%s721_s3 + $0x80] ss:$12 sps:$4 sm:$0xff]   ;;  %v535_v30 = vld [vmem:[%s721_s3 + $0xa8] ss:$12 sps:$4 sm:$0xff]   ;;  %v536_v31 = vld [vmem:[%s721_s3 + $0x98] ss:$12 sps:$4 sm:$0xff]  }
   0xa   :  { %31 = vadd.xlane.f32.xlu0 %v598_v5  ;;  %488 = vmatpush3.bf16.msra.mxu1 %v518_v16  ;;  %v537_v32 = vld [vmem:[%s721_s3 + $0xb0] ss:$12 sps:$4 sm:$0xff]   ;;  %v433_v2 = vld [vmem:[%s722_s1] ss:$0 sm:$0xff] }
   0xb   :  { %489 = vmatprep.subr.bf16.mxu1 %v522_v19  ;;  %v434_v9 = vld [vmem:[%s723_s2] ss:$0 sm:$0xff] }
   0xc   :  { %33 = vadd.xlane.f32.xlu1 %v604_v6  ;;  %284 = vmatpush1.bf16.msra.mxu0 %v515_v14 }
   0xd   :  { %285 = vmatprep.subr.bf16.mxu0 %v516_v15 }
   0xe   :  { %48 = vadd.xlane.f32.xlu0 %v42_v7  ;;  %490 = vmatpush3.bf16.msra.mxu1 %v522_v19 }
   0xf   :  { %491 = vmatprep.subr.bf16.mxu1 %v526_v22 }
  0x10   :  { %50 = vadd.xlane.f32.xlu1 %v43_v8  ;;  %286 = vmatpush1.bf16.msra.mxu0 %v519_v17 }
  0x11   :  { %287 = vmatprep.subr.bf16.mxu0 %v520_v18 }
  0x12   :  { %492 = vmatpush3.bf16.msra.mxu1 %v526_v22 }
  0x13   :  { %493 = vmatprep.subr.bf16.mxu1 %v530_v25 }
  0x14   :  { %288 = vmatpush1.bf16.msra.mxu0 %v523_v20 }
  0x15   :  { %289 = vmatprep.subr.bf16.mxu0 %v524_v21 }
  0x16   :  { %494 = vmatpush3.bf16.msra.mxu1 %v530_v25 }
  0x17   :  { %495 = vmatprep.subr.bf16.mxu1 %v534_v28 }
  0x18   :  { %290 = vmatpush1.bf16.msra.mxu0 %v527_v23 }
  0x19   :  { %291 = vmatprep.subr.bf16.mxu0 %v528_v24 }
  0x1a   :  { %496 = vmatpush3.bf16.msra.mxu1 %v534_v28 }
  0x1b   :  { %497 = vmatprep.subr.bf16.mxu1 %v536_v31 }
  0x1c   :  { %292 = vmatpush1.bf16.msra.mxu0 %v531_v26 }
  0x1d   :  { %293 = vmatprep.subr.bf16.mxu0 %v532_v27 }
  0x1e   :  { %498 = vmatpush3.bf16.msra.mxu1 %v536_v31 }
  0x1f   :  { %499 = vmatprep.subr.bf16.mxu1 %v537_v32 }
  0x20   :  { %294 = vmatpush1.bf16.msra.mxu0 %v535_v30 }
  0x22   :  { %500 = vmatpush3.bf16.msra.mxu1 %v537_v32 }
  0x8f   :  { %v28_v33 = vpop.xlane.xlu0 %27 }
  0x90   :  { %v36_v34 = vmul.f32 0.0078125, %v28_v33 }
  0x91   :  { %v45_v35 = vpop.xlane.xlu1 %44 }
  0x92   :  { %v56_v36 = vmul.f32 %v36_v34, %v36_v34  ;;  %v52_v37 = vmul.f32 0.0078125, %v45_v35  ;;  %v64_v60 = vsub.f32 %v580_v0, %v36_v34 }
  0x93   :  { %v30_v38 = vpop.xlane.xlu0 %29 }
  0x94   :  { %v60_v39 = vsub.f32 %v52_v37, %v56_v36  ;;  %v37_v40 = vmul.f32 0.0078125, %v30_v38 }
  0x95   :  { %v47_v41 = vpop.xlane.xlu1 %46 }
  0x96   :  { %v68_v42 = vadd.f32 1e-05, %v60_v39  ;;  %v57_v43 = vmul.f32 %v37_v40, %v37_v40  ;;  %v53_v44 = vmul.f32 0.0078125, %v47_v41  ;;  %v65_v3 = vsub.f32 %v585_v1, %v37_v40 }
  0x97   :  { %v32_v45 = vpop.xlane.xlu0 %31 }
  0x98   :  { %538 = vrsqrt.f32 %v68_v42  ;;  %v61_v46 = vsub.f32 %v53_v44, %v57_v43  ;;  %v38_v47 = vmul.f32 0.0078125, %v32_v45 }
  0x99   :  { %v34_v48 = vpop.xlane.xlu1 %33 }
  0x9a   :  { %v69_v49 = vadd.f32 1e-05, %v61_v46  ;;  %v58_v50 = vmul.f32 %v38_v47, %v38_v47  ;;  %v39_v51 = vmul.f32 0.0078125, %v34_v48  ;;  %v66_v0 = vsub.f32 %v598_v5, %v38_v47 }
  0x9b   :  { %v49_v52 = vpop.xlane.xlu0 %48  ;;  %v136_v5 = vlaneseq }
  0x9c   :  { %540 = vrsqrt.f32 %v69_v49  ;;  %v54_v53 = vmul.f32 0.0078125, %v49_v52  ;;  %v59_v55 = vmul.f32 %v39_v51, %v39_v51  ;;  %v67_v14 = vsub.f32 %v604_v6, %v39_v51  ;;  %v134_v6 = vld [vmem:[%s724_s4] sm:$0x7] }
  0x9d   :  { %v51_v54 = vpop.xlane.xlu1 %50  ;;  %v137_v23 = vshrl.u32 %v136_v5, 7 }
  0x9e   :  { %v62_v56 = vsub.f32 %v54_v53, %v58_v50  ;;  %v55_v57 = vmul.f32 0.0078125, %v51_v54 }
  0x9f   :  { %v138_v24 = vsub.s32 0, %v137_v23  ;;  %v142_v25 = vsub.s32 1, %v137_v23 }
  0xa0   :  { %v70_v58 = vadd.f32 1e-05, %v62_v56  ;;  %v63_v59 = vsub.f32 %v55_v57, %v59_v55 }
  0xa1   :  { %v139_v26 = vrot.slane %v134_v6, %v138_v24  ;;  %v143_v27 = vrot.slane %v134_v6, %v142_v25 }
  0xa2   :  { %v539_v61 = vpop.eup %538  ;;  %542 = vrsqrt.f32 %v70_v58  ;;  %v71_v62 = vadd.f32 1e-05, %v63_v59 }
  0xa3   :  { %v76_v63 = vmul.f32 %v539_v61, %v64_v60 }
  0xa4   :  { %544 = vrsqrt.f32 %v71_v62 }
  0xa5   :  { %v86_v8 = vmul.f32 %v433_v2, %v76_v63 }
  0xa6   :  { %v541_v4 = vpop.eup %540 }
  0xa7   :  { %v77_v7 = vmul.f32 %v541_v4, %v65_v3  ;;  %v96_v11 = vadd.f32 %v434_v9, %v86_v8 }
  0xa9   :  { %v87_v10 = vmul.f32 %v433_v2, %v77_v7 }
  0xab   :  { %v97_v12 = vadd.f32 %v434_v9, %v87_v10 }
  0xac   :  { %v543_v13 = vpop.eup %542 }
  0xad   :  { %v100_v15 = vpack.c.bf16 %v97_v12, %v96_v11  ;;  %v78_v16 = vmul.f32 %v543_v13, %v66_v0 }
  0xae   :  { %v545_v17 = vpop.eup %544 }
  0xaf   :  { %312 = vmatmul.mubr.bf16.vlgmr.msra.gmra.mrb[0].mxu0 %v100_v15  ;;  %501 = vmatprep.mubr.bf16.mxu1 %v100_v15  ;;  %v79_v1 = vmul.f32 %v545_v17, %v67_v14  ;;  %v88_v18 = vmul.f32 %v433_v2, %v78_v16 }
  0xb0   :  { %321 = vmatprep.mubr.bf16.mxu0 %v546_v29  ;;  %v146_v29 = vsub.s32 2, %v137_v23 }
  0xb1   :  { %v89_v19 = vmul.f32 %v433_v2, %v79_v1  ;;  %v98_v20 = vadd.f32 %v434_v9, %v88_v18 }
  0xb2   :  { %v147_v38 = vrot.slane %v134_v6, %v146_v29 }
  0xb3   :  { %v99_v21 = vadd.f32 %v434_v9, %v89_v19 }
  0xb5   :  { %v101_v22 = vpack.c.bf16 %v99_v21, %v98_v20 }
  0xb7   :  { %322 = vmatmul.mubr.bf16.gmra.mrb[4].mxu0 %v101_v22  ;;  %502 = vmatmul.mubr.bf16.vlgmr.msra.gmra.mrb[0].mxu1 %v101_v22 }
 0x182   :  { %v313_v28 = vpop.f32.mrb[0].mxu0 }
 0x183   :  { %v314_v30 = vadd.f32 %v313_v28, %v139_v26  ;;  %v315_v31 = vpop.f32.mrb[1].mxu0 }
 0x184   :  { %v316_v32 = vadd.f32 %v315_v31, %v143_v27  ;;  %v317_v33 = vpop.f32.mrb[2].mxu0 }
 0x185   :  { %v318_v34 = vadd.f32 %v317_v33, %v139_v26  ;;  %v319_v35 = vpop.f32.mrb[3].mxu0 }
 0x186   :  { %v467_v36 = vpack.c.bf16 %v316_v32, %v314_v30  ;;  %v320_v37 = vadd.f32 %v319_v35, %v143_v27 }
 0x188   :  { %421 = vst [vmem:[%s725_s5] sm:$0xff] %v467_v36  ;;  %v469_v39 = vpack.c.bf16 %v320_v37, %v318_v34 }
 0x18a   :  { %423 = vst [vmem:[%s725_s5 + $0xc] sm:$0xff] %v469_v39  ;;  %v323_v40 = vpop.f32.mrb[4].mxu0  ;;  %v503_v41 = vpop.f32.mrb[0].mxu1 }
 0x18b   :  { %v324_v42 = vadd.f32 %v323_v40, %v139_v26  ;;  %v375_v43 = vadd.f32 %v503_v41, %v147_v38  ;;  %v325_v44 = vpop.f32.mrb[5].mxu0  ;;  %v366_v45 = vpop.f32.mrb[1].mxu1 }
 0x18c   :  { %v326_v46 = vadd.f32 %v325_v44, %v143_v27  ;;  %v367_v47 = vadd.f32 %v366_v45, %v147_v38  ;;  %v327_v48 = vpop.f32.mrb[6].mxu0  ;;  %v504_v49 = vpop.f32.mrb[2].mxu1 }
 0x18d   :  { %v472_v50 = vpack.c.bf16 %v375_v43, %v375_v43  ;;  %v328_v51 = vadd.f32 %v327_v48, %v139_v26  ;;  %v378_v52 = vadd.f32 %v504_v49, %v147_v38  ;;  %v329_v53 = vpop.f32.mrb[7].mxu0  ;;  %v369_v54 = vpop.f32.mrb[3].mxu1 }
 0x18e   :  { %v471_v55 = vpack.c.bf16 %v326_v46, %v324_v42  ;;  %v468_v56 = vpack.c.bf16 %v367_v47, %v367_v47  ;;  %v330_v57 = vadd.f32 %v329_v53, %v143_v27  ;;  %v370_v58 = vadd.f32 %v369_v54, %v147_v38 }
 0x18f   :  { %426 = vst [vmem:[%s725_s5 + $0x20] sm:$0xf] %v472_v50  ;;  %v474_v59 = vpack.c.bf16 %v378_v52, %v378_v52 }
 0x190   :  { %425 = vst [vmem:[%s725_s5 + $0x18] sm:$0xff] %v471_v55  ;;  %422 = vst [vmem:[%s725_s5 + $0x8] sm:$0xf] %v468_v56  ;;  %v473_v60 = vpack.c.bf16 %v330_v57, %v328_v51  ;;  %v470_v61 = vpack.c.bf16 %v370_v58, %v370_v58 }
 0x191   :  { %428 = vst [vmem:[%s725_s5 + $0x2c] sm:$0xf] %v474_v59 }
 0x192   :  { %427 = vst [vmem:[%s725_s5 + $0x24] sm:$0xff] %v473_v60  ;;  %424 = vst [vmem:[%s725_s5 + $0x14] sm:$0xf] %v470_v61 }

// kernel: transformer_encoder.15
= control target key start
LH: loop header
LB: loop body
LE: loop exit
PB: predicated region body
PF: predicated region fallthrough
CT: control target
= control target key end

     0   :  { %s173_s0 = inlined_call_operand.vmem [shape: f32[32,128], index: 0, kind: input, shape index: {}]   ;;  %s174_s1 = inlined_call_operand.vmem [shape: f32[1,128], index: 1, kind: input, shape index: {}]   ;;  %s175_s2 = inlined_call_operand.vmem [shape: f32[1,128], index: 2, kind: input, shape index: {}]   ;;  %s176_s3 = inlined_call_operand.vmem [shape: f32[32,128], index: 3, kind: output, shape index: {}]  }
   0x1   :  { %v134_v0 = vld [vmem:[%s173_s0 + $0x10] sm:$0xff]  ;;  %v14_v1 = vld [vmem:[%s173_s0] sm:$0xff]  ;;  %v143_v2 = vld [vmem:[%s173_s0 + $0x18] sm:$0xff] }
   0x2   :  { %24 = vadd.xlane.f32.xlu1 %v134_v0  ;;  %20 = vadd.xlane.f32.xlu0 %v14_v1  ;;  %v15_v3 = vld [vmem:[%s173_s0 + $0x8] sm:$0xff]  ;;  %v33_v5 = vmul.f32 %v14_v1, %v14_v1  ;;  %v36_v6 = vmul.f32 %v143_v2, %v143_v2  ;;  %v35_v7 = vmul.f32 %v134_v0, %v134_v0  ;;  %v101_v39 = vld [vmem:[%s174_s1] ss:$0 sm:$0xff] }
   0x3   :  { %v34_v4 = vmul.f32 %v15_v3, %v15_v3  ;;  %v102_v42 = vld [vmem:[%s175_s2] ss:$0 sm:$0xff] }
   0x6   :  { %26 = vadd.xlane.f32.xlu1 %v143_v2  ;;  %22 = vadd.xlane.f32.xlu0 %v15_v3 }
   0xa   :  { %39 = vadd.xlane.f32.xlu1 %v34_v4  ;;  %37 = vadd.xlane.f32.xlu0 %v33_v5 }
   0xe   :  { %43 = vadd.xlane.f32.xlu1 %v36_v6  ;;  %41 = vadd.xlane.f32.xlu0 %v35_v7 }
  0x8f   :  { %v25_v8 = vpop.xlane.xlu1 %24  ;;  %v21_v9 = vpop.xlane.xlu0 %20 }
  0x90   :  { %v29_v12 = vmul.f32 0.0078125, %v21_v9  ;;  %v31_v14 = vmul.f32 0.0078125, %v25_v8 }
  0x92   :  { %v49_v18 = vmul.f32 %v29_v12, %v29_v12  ;;  %v51_v24 = vmul.f32 %v31_v14, %v31_v14  ;;  %v57_v38 = vsub.f32 %v14_v1, %v29_v12  ;;  %v59_v47 = vsub.f32 %v134_v0, %v31_v14 }
  0x93   :  { %v27_v10 = vpop.xlane.xlu1 %26  ;;  %v23_v11 = vpop.xlane.xlu0 %22 }
  0x94   :  { %v30_v13 = vmul.f32 0.0078125, %v23_v11  ;;  %v32_v15 = vmul.f32 0.0078125, %v27_v10 }
  0x96   :  { %v50_v19 = vmul.f32 %v30_v13, %v30_v13  ;;  %v52_v25 = vmul.f32 %v32_v15, %v32_v15  ;;  %v58_v36 = vsub.f32 %v15_v3, %v30_v13  ;;  %v60_v44 = vsub.f32 %v143_v2, %v32_v15 }
  0x97   :  { %v40_v16 = vpop.xlane.xlu1 %39  ;;  %v38_v17 = vpop.xlane.xlu0 %37 }
  0x98   :  { %v46_v20 = vmul.f32 0.0078125, %v40_v16  ;;  %v45_v21 = vmul.f32 0.0078125, %v38_v17 }
  0x9a   :  { %v54_v22 = vsub.f32 %v46_v20, %v50_v19  ;;  %v53_v23 = vsub.f32 %v45_v21, %v49_v18 }
  0x9b   :  { %v44_v26 = vpop.xlane.xlu1 %43  ;;  %v42_v27 = vpop.xlane.xlu0 %41 }
  0x9c   :  { %v62_v28 = vadd.f32 1e-05, %v54_v22  ;;  %v61_v29 = vadd.f32 1e-05, %v53_v23  ;;  %v48_v30 = vmul.f32 0.0078125, %v44_v26  ;;  %v47_v31 = vmul.f32 0.0078125, %v42_v27 }
  0x9e   :  { %103 = vrsqrt.f32 %v62_v28  ;;  %v56_v32 = vsub.f32 %v48_v30, %v52_v25  ;;  %v55_v33 = vsub.f32 %v47_v31, %v51_v24 }
  0x9f   :  { %105 = vrsqrt.f32 %v61_v29 }
  0xa0   :  { %v64_v34 = vadd.f32 1e-05, %v56_v32  ;;  %v63_v35 = vadd.f32 1e-05, %v55_v33 }
  0xa2   :  { %107 = vrsqrt.f32 %v64_v34 }
  0xa3   :  { %109 = vrsqrt.f32 %v63_v35 }
  0xa8   :  { %v104_v37 = vpop.eup %103 }
  0xa9   :  { %v106_v40 = vpop.eup %105  ;;  %v70_v41 = vmul.f32 %v104_v37, %v58_v36 }
  0xaa   :  { %v69_v43 = vmul.f32 %v106_v40, %v57_v38 }
  0xab   :  { %v80_v45 = vmul.f32 %v101_v39, %v70_v41 }
  0xac   :  { %v108_v46 = vpop.eup %107  ;;  %v79_v48 = vmul.f32 %v101_v39, %v69_v43 }
  0xad   :  { %v110_v49 = vpop.eup %109  ;;  %v90_v50 = vadd.f32 %v102_v42, %v80_v45  ;;  %v72_v51 = vmul.f32 %v108_v46, %v60_v44 }
  0xae   :  { %v89_v52 = vadd.f32 %v102_v42, %v79_v48  ;;  %v71_v53 = vmul.f32 %v110_v49, %v59_v47 }
  0xaf   :  { %94 = vst [vmem:[%s176_s3 + $0x8] sm:$0xff] %v90_v50  ;;  %v82_v54 = vmul.f32 %v101_v39, %v72_v51 }
  0xb0   :  { %93 = vst [vmem:[%s176_s3] sm:$0xff] %v89_v52  ;;  %v81_v55 = vmul.f32 %v101_v39, %v71_v53 }
  0xb1   :  { %v92_v56 = vadd.f32 %v102_v42, %v82_v54 }
  0xb2   :  { %v91_v57 = vadd.f32 %v102_v42, %v81_v55 }
  0xb3   :  { %96 = vst [vmem:[%s176_s3 + $0x18] sm:$0xff] %v92_v56 }
  0xb4   :  { %95 = vst [vmem:[%s176_s3 + $0x10] sm:$0xff] %v91_v57 }

// kernel: transformer_encoder.11
= control target key start
LH: loop header
LB: loop body
LE: loop exit
PB: predicated region body
PF: predicated region fallthrough
CT: control target
= control target key end

     0   :  { %v589_v23 = vmov 0   ;;  %s792_s0 = inlined_call_operand.vmem [shape: f32[32,128], index: 0, kind: input, shape index: {}]   ;;  %s793_s3 = inlined_call_operand.vmem [shape: bf16[128,256], index: 3, kind: input, shape index: {}]   ;;  %s794_s5 = inlined_call_operand.vmem [shape: bf16[256,128], index: 5, kind: input, shape index: {}]   ;;  %s795_s1 = inlined_call_operand.vmem [shape: f32[1,128], index: 1, kind: input, shape index: {}]   ;;  %s796_s2 = inlined_call_operand.vmem [shape: f32[1,128], index: 2, kind: input, shape index: {}]   ;;  %s797_s4 = inlined_call_operand.vmem [shape: f32[1,256], index: 4, kind: input, shape index: {}]   ;;  %s798_s6 = inlined_call_operand.vmem [shape: f32[1,128], index: 6, kind: input, shape index: {}]   ;;  %s799_s7 = inlined_call_operand.vmem [shape: f32[32,128], index: 7, kind: output, shape index: {}]  }
   0x1   :  { %v633_v0 = vld [vmem:[%s792_s0] sm:$0xff]  ;;  %v638_v1 = vld [vmem:[%s792_s0 + $0x8] sm:$0xff]  ;;  %v651_v5 = vld [vmem:[%s792_s0 + $0x10] sm:$0xff]  ;;  %248 = vmatprep.mubr.bf16.mxu0 %v589_v23 }
   0x2   :  { %33 = vadd.xlane.f32.xlu0 %v633_v0  ;;  %v46_v2 = vmul.f32 %v633_v0, %v633_v0  ;;  %v541_v3 = vld [vmem:[%s793_s3 + $0x4] ss:$8 sps:$4 sm:$0xff]   ;;  %v47_v4 = vmul.f32 %v638_v1, %v638_v1  ;;  %v657_v6 = vld [vmem:[%s792_s0 + $0x18] sm:$0xff]  ;;  %v48_v7 = vmul.f32 %v651_v5, %v651_v5  ;;  %v543_v9 = vld [vmem:[%s793_s3] ss:$8 sps:$4 sm:$0xff]  }
   0x3   :  { %216 = vmatprep.subr.bf16.mxu0 %v541_v3  ;;  %v49_v8 = vmul.f32 %v657_v6, %v657_v6  ;;  %v544_v10 = vld [vmem:[%s793_s3 + $0x14] ss:$8 sps:$4 sm:$0xff]   ;;  %v546_v11 = vld [vmem:[%s793_s3 + $0x10] ss:$8 sps:$4 sm:$0xff]   ;;  %v547_v12 = vld [vmem:[%s793_s3 + $0x24] ss:$8 sps:$4 sm:$0xff]  }
   0x4   :  { %50 = vadd.xlane.f32.xlu1 %v46_v2  ;;  %217 = vmatpush1.bf16.msra.mxu0 %v543_v9  ;;  %v549_v13 = vld [vmem:[%s793_s3 + $0x20] ss:$8 sps:$4 sm:$0xff]   ;;  %v550_v14 = vld [vmem:[%s793_s3 + $0x34] ss:$8 sps:$4 sm:$0xff]   ;;  %v552_v15 = vld [vmem:[%s793_s3 + $0x30] ss:$8 sps:$4 sm:$0xff]  }
   0x5   :  { %218 = vmatprep.subr.bf16.mxu0 %v544_v10  ;;  %v553_v16 = vld [vmem:[%s793_s3 + $0x44] ss:$8 sps:$4 sm:$0xff]   ;;  %v555_v17 = vld [vmem:[%s793_s3 + $0x40] ss:$8 sps:$4 sm:$0xff]   ;;  %v556_v18 = vld [vmem:[%s793_s3 + $0x54] ss:$8 sps:$4 sm:$0xff]  }
   0x6   :  { %35 = vadd.xlane.f32.xlu0 %v638_v1  ;;  %v558_v19 = vld [vmem:[%s793_s3 + $0x50] ss:$8 sps:$4 sm:$0xff]   ;;  %v559_v20 = vld [vmem:[%s793_s3 + $0x64] ss:$8 sps:$4 sm:$0xff]   ;;  %v561_v21 = vld [vmem:[%s793_s3 + $0x60] ss:$8 sps:$4 sm:$0xff]  }
   0x7   :  { %v562_v22 = vld [vmem:[%s793_s3 + $0x74] ss:$8 sps:$4 sm:$0xff]   ;;  %v564_v24 = vld [vmem:[%s793_s3 + $0x70] ss:$8 sps:$4 sm:$0xff]   ;;  %v565_v25 = vld [vmem:[%s794_s5 + $0x40] sm:$0xff]  }
   0x8   :  { %52 = vadd.xlane.f32.xlu1 %v47_v4  ;;  %219 = vmatpush1.bf16.msra.mxu0 %v546_v11  ;;  %v566_v26 = vld [vmem:[%s794_s5] sm:$0xff]   ;;  %v567_v27 = vld [vmem:[%s794_s5 + $0x48] sm:$0xff]   ;;  %v569_v29 = vld [vmem:[%s794_s5 + $0x50] sm:$0xff]  }
   0x9   :  { %220 = vmatprep.subr.bf16.mxu0 %v547_v12  ;;  %512 = vmatprep.subr.bf16.mxu1 %v565_v25  ;;  %v568_v28 = vld [vmem:[%s794_s5 + $0x8] sm:$0xff]   ;;  %v570_v30 = vld [vmem:[%s794_s5 + $0x10] sm:$0xff]   ;;  %v571_v31 = vld [vmem:[%s794_s5 + $0x58] sm:$0xff]  }
   0xa   :  { %37 = vadd.xlane.f32.xlu0 %v651_v5  ;;  %513 = vmatpush3.bf16.msra.mxu1 %v566_v26  ;;  %v572_v32 = vld [vmem:[%s794_s5 + $0x18] sm:$0xff]   ;;  %v573_v33 = vld [vmem:[%s794_s5 + $0x60] sm:$0xff]   ;;  %v575_v35 = vld [vmem:[%s794_s5 + $0x68] sm:$0xff]  }
   0xb   :  { %514 = vmatprep.subr.bf16.mxu1 %v567_v27  ;;  %v574_v34 = vld [vmem:[%s794_s5 + $0x20] sm:$0xff]  }
   0xc   :  { %39 = vadd.xlane.f32.xlu1 %v657_v6  ;;  %221 = vmatpush1.bf16.msra.mxu0 %v549_v13  ;;  %v478_v12 = vld [vmem:[%s796_s2] ss:$0 sm:$0xff] }
   0xd   :  { %222 = vmatprep.subr.bf16.mxu0 %v550_v14 }
   0xe   :  { %54 = vadd.xlane.f32.xlu0 %v48_v7  ;;  %515 = vmatpush3.bf16.msra.mxu1 %v568_v28  ;;  %v477_v7 = vld [vmem:[%s795_s1] ss:$0 sm:$0xff] }
   0xf   :  { %516 = vmatprep.subr.bf16.mxu1 %v569_v29  ;;  %v576_v29 = vld [vmem:[%s794_s5 + $0x28] sm:$0xff]  }
  0x10   :  { %56 = vadd.xlane.f32.xlu1 %v49_v8  ;;  %223 = vmatpush1.bf16.msra.mxu0 %v552_v15 }
  0x11   :  { %224 = vmatprep.subr.bf16.mxu0 %v553_v16 }
  0x12   :  { %517 = vmatpush3.bf16.msra.mxu1 %v570_v30  ;;  %v577_v30 = vld [vmem:[%s794_s5 + $0x70] sm:$0xff]  }
  0x13   :  { %518 = vmatprep.subr.bf16.mxu1 %v571_v31  ;;  %v578_v31 = vld [vmem:[%s794_s5 + $0x30] sm:$0xff]  }
  0x14   :  { %225 = vmatpush1.bf16.msra.mxu0 %v555_v17 }
  0x15   :  { %226 = vmatprep.subr.bf16.mxu0 %v556_v18 }
  0x16   :  { %519 = vmatpush3.bf16.msra.mxu1 %v572_v32  ;;  %v580_v32 = vld [vmem:[%s794_s5 + $0x38] sm:$0xff]  }
  0x17   :  { %520 = vmatprep.subr.bf16.mxu1 %v573_v33  ;;  %v126_v33 = vlaneseq }
  0x18   :  { %227 = vmatpush1.bf16.msra.mxu0 %v558_v19 }
  0x19   :  { %228 = vmatprep.subr.bf16.mxu0 %v559_v20 }
  0x1a   :  { %521 = vmatpush3.bf16.msra.mxu1 %v574_v34  ;;  %v127_v34 = vshrl.u32 %v126_v33, 7 }
  0x1b   :  { %522 = vmatprep.subr.bf16.mxu1 %v575_v35 }
  0x1c   :  { %229 = vmatpush1.bf16.msra.mxu0 %v561_v21  ;;  %v128_v35 = vsub.s32 0, %v127_v34 }
  0x1d   :  { %230 = vmatprep.subr.bf16.mxu0 %v562_v22 }
  0x1e   :  { %523 = vmatpush3.bf16.msra.mxu1 %v576_v29 }
  0x1f   :  { %524 = vmatprep.subr.bf16.mxu1 %v577_v30 }
  0x20   :  { %231 = vmatpush1.bf16.msra.mxu0 %v564_v24 }
  0x22   :  { %525 = vmatpush3.bf16.msra.mxu1 %v578_v31 }
  0x8f   :  { %v34_v36 = vpop.xlane.xlu0 %33 }
  0x90   :  { %v42_v37 = vmul.f32 0.0078125, %v34_v36  ;;  %v124_v36 = vld [vmem:[%s797_s4] sm:$0x3] }
  0x91   :  { %v51_v38 = vpop.xlane.xlu1 %50 }
  0x92   :  { %v62_v39 = vmul.f32 %v42_v37, %v42_v37  ;;  %v58_v40 = vmul.f32 0.0078125, %v51_v38  ;;  %v70_v63 = vsub.f32 %v633_v0, %v42_v37  ;;  %v132_v37 = vsub.s32 1, %v127_v34 }
  0x93   :  { %v36_v41 = vpop.xlane.xlu0 %35  ;;  %v129_v38 = vrot.slane %v124_v36, %v128_v35 }
  0x94   :  { %v66_v42 = vsub.f32 %v58_v40, %v62_v39  ;;  %v43_v43 = vmul.f32 0.0078125, %v36_v41  ;;  %v133_v39 = vrot.slane %v124_v36, %v132_v37 }
  0x95   :  { %v53_v44 = vpop.xlane.xlu1 %52 }
  0x96   :  { %v74_v45 = vadd.f32 1e-05, %v66_v42  ;;  %v63_v46 = vmul.f32 %v43_v43, %v43_v43  ;;  %v59_v47 = vmul.f32 0.0078125, %v53_v44  ;;  %v71_v8 = vsub.f32 %v638_v1, %v43_v43 }
  0x97   :  { %v38_v48 = vpop.xlane.xlu0 %37 }
  0x98   :  { %581 = vrsqrt.f32 %v74_v45  ;;  %v67_v49 = vsub.f32 %v59_v47, %v63_v46  ;;  %v44_v50 = vmul.f32 0.0078125, %v38_v48 }
  0x99   :  { %v40_v51 = vpop.xlane.xlu1 %39 }
  0x9a   :  { %v75_v52 = vadd.f32 1e-05, %v67_v49  ;;  %v64_v53 = vmul.f32 %v44_v50, %v44_v50  ;;  %v45_v54 = vmul.f32 0.0078125, %v40_v51  ;;  %v72_v14 = vsub.f32 %v651_v5, %v44_v50 }
  0x9b   :  { %v55_v55 = vpop.xlane.xlu0 %54 }
  0x9c   :  { %583 = vrsqrt.f32 %v75_v52  ;;  %v60_v56 = vmul.f32 0.0078125, %v55_v55  ;;  %v65_v58 = vmul.f32 %v45_v54, %v45_v54  ;;  %v73_v18 = vsub.f32 %v657_v6, %v45_v54 }
  0x9d   :  { %v57_v57 = vpop.xlane.xlu1 %56 }
  0x9e   :  { %v68_v59 = vsub.f32 %v60_v56, %v64_v53  ;;  %v61_v60 = vmul.f32 0.0078125, %v57_v57 }
  0xa0   :  { %v76_v61 = vadd.f32 1e-05, %v68_v59  ;;  %v69_v62 = vsub.f32 %v61_v60, %v65_v58 }
  0xa2   :  { %v582_v2 = vpop.eup %581  ;;  %585 = vrsqrt.f32 %v76_v61  ;;  %v77_v3 = vadd.f32 1e-05, %v69_v62 }
  0xa3   :  { %v82_v4 = vmul.f32 %v582_v2, %v70_v63 }
  0xa4   :  { %587 = vrsqrt.f32 %v77_v3 }
  0xa5   :  { %v92_v11 = vmul.f32 %v477_v7, %v82_v4 }
  0xa6   :  { %v584_v9 = vpop.eup %583 }
  0xa7   :  { %v83_v10 = vmul.f32 %v584_v9, %v71_v8  ;;  %v102_v15 = vadd.f32 %v478_v12, %v92_v11  ;;  %v495_v9 = vld [vmem:[%s798_s6] ss:$0 sm:$0xff] }
  0xa9   :  { %v93_v13 = vmul.f32 %v477_v7, %v83_v10 }
  0xab   :  { %v103_v16 = vadd.f32 %v478_v12, %v93_v13 }
  0xac   :  { %v586_v17 = vpop.eup %585 }
  0xad   :  { %v106_v19 = vpack.c.bf16 %v103_v16, %v102_v15  ;;  %v84_v20 = vmul.f32 %v586_v17, %v72_v14 }
  0xae   :  { %v588_v21 = vpop.eup %587 }
  0xaf   :  { %249 = vmatmul.mubr.bf16.vlgmr.msra.gmra.mrb[0].mxu0 %v106_v19  ;;  %v85_v22 = vmul.f32 %v588_v21, %v73_v18  ;;  %v94_v24 = vmul.f32 %v477_v7, %v84_v20 }
  0xb0   :  { %258 = vmatprep.mubr.bf16.mxu0 %v589_v23  ;;  %v579_v23 = vld [vmem:[%s794_s5 + $0x78] sm:$0xff]  }
  0xb1   :  { %v95_v25 = vmul.f32 %v477_v7, %v85_v22  ;;  %v104_v26 = vadd.f32 %v478_v12, %v94_v24  ;;  %526 = vmatprep.subr.bf16.mxu1 %v579_v23 }
  0xb2   :  { %527 = vmatpush3.bf16.msra.mxu1 %v580_v32 }
  0xb3   :  { %v105_v27 = vadd.f32 %v478_v12, %v95_v25 }
  0xb5   :  { %v107_v28 = vpack.c.bf16 %v105_v27, %v104_v26 }
  0xb7   :  { %259 = vmatmul.mubr.bf16.gmra.mrb[4].mxu0 %v107_v28 }
 0x182   :  { %v250_v40 = vpop.f32.mrb[0].mxu0 }
 0x183   :  { %v251_v41 = vadd.f32 %v250_v40, %v129_v38  ;;  %v252_v42 = vpop.f32.mrb[1].mxu0 }
 0x184   :  { %v253_v43 = vadd.f32 %v252_v42, %v133_v39  ;;  %v254_v44 = vpop.f32.mrb[2].mxu0 }
 0x185   :  { %v255_v45 = vadd.f32 %v254_v44, %v129_v38  ;;  %v256_v46 = vpop.f32.mrb[3].mxu0  ;;  %v269_v48 = vmax.f32 %v251_v41, 0.0 }
 0x186   :  { %v257_v47 = vadd.f32 %v256_v46, %v133_v39  ;;  %v270_v50 = vmax.f32 %v253_v43, 0.0 }
 0x187   :  { %v271_v49 = vmax.f32 %v255_v45, 0.0 }
 0x188   :  { %v272_v51 = vmax.f32 %v257_v47, 0.0 }
 0x189   :  { %v277_v52 = vpack.c.bf16 %v271_v49, %v269_v48 }
 0x18a   :  { %v260_v53 = vpop.f32.mrb[4].mxu0  ;;  %v278_v54 = vpack.c.bf16 %v272_v51, %v270_v50 }
 0x18b   :  { %v261_v55 = vadd.f32 %v260_v53, %v129_v38  ;;  %v262_v56 = vpop.f32.mrb[5].mxu0 }
 0x18c   :  { %v263_v57 = vadd.f32 %v262_v56, %v133_v39  ;;  %v264_v58 = vpop.f32.mrb[6].mxu0  ;;  %448 = vmatprep.mubr.bf16.mxu1 %v278_v54 }
 0x18d   :  { %v265_v59 = vadd.f32 %v264_v58, %v129_v38  ;;  %v266_v60 = vpop.f32.mrb[7].mxu0  ;;  %449 = vmatmul.mubr.bf16.vlgmr.msra.gmra.mrb[0].mxu1 %v277_v52  ;;  %v273_v62 = vmax.f32 %v261_v55, 0.0 }
 0x18e   :  { %v267_v61 = vadd.f32 %v266_v60, %v133_v39  ;;  %v274_v2 = vmax.f32 %v263_v57, 0.0 }
 0x18f   :  { %v275_v63 = vmax.f32 %v265_v59, 0.0 }
 0x190   :  { %v276_v3 = vmax.f32 %v267_v61, 0.0 }
 0x191   :  { %v279_v4 = vpack.c.bf16 %v275_v63, %v273_v62 }
 0x192   :  { %v280_v7 = vpack.c.bf16 %v276_v3, %v274_v2 }
 0x194   :  { %456 = vmatprep.mubr.bf16.mxu1 %v280_v7 }
 0x195   :  { %457 = vmatmul.mubr.bf16.gmra.mrb[4].mxu1 %v279_v4 }
 0x260   :  { %v528_v8 = vpop.f32.mrb[0].mxu1 }
 0x261   :  { %v529_v10 = vpop.f32.mrb[1].mxu1 }
 0x262   :  { %v530_v11 = vadd.f32 %v529_v10, %v528_v8  ;;  %v531_v12 = vpop.f32.mrb[2].mxu1 }
 0x263   :  { %v532_v13 = vpop.f32.mrb[3].mxu1 }
 0x264   :  { %v451_v14 = vadd.f32 %v530_v11, %v495_v9  ;;  %v533_v15 = vadd.f32 %v532_v13, %v531_v12 }
 0x266   :  { %v465_v16 = vadd.f32 %v451_v14, %v633_v0  ;;  %v454_v17 = vadd.f32 %v533_v15, %v495_v9 }
 0x268   :  { %469 = vst [vmem:[%s799_s7] sm:$0xff] %v465_v16  ;;  %v466_v18 = vadd.f32 %v454_v17, %v638_v1  ;;  %v534_v19 = vpop.f32.mrb[4].mxu1 }
 0x269   :  { %v535_v20 = vpop.f32.mrb[5].mxu1 }
 0x26a   :  { %470 = vst [vmem:[%s799_s7 + $0x8] sm:$0xff] %v466_v18  ;;  %v536_v21 = vadd.f32 %v535_v20, %v534_v19  ;;  %v537_v22 = vpop.f32.mrb[6].mxu1 }
 0x26b   :  { %v538_v24 = vpop.f32.mrb[7].mxu1 }
 0x26c   :  { %v459_v25 = vadd.f32 %v536_v21, %v495_v9  ;;  %v539_v26 = vadd.f32 %v538_v24, %v537_v22 }
 0x26e   :  { %v467_v0 = vadd.f32 %v459_v25, %v651_v5  ;;  %v462_v27 = vadd.f32 %v539_v26, %v495_v9 }
 0x270   :  { %471 = vst [vmem:[%s799_s7 + $0x10] sm:$0xff] %v467_v0  ;;  %v468_v1 = vadd.f32 %v462_v27, %v657_v6 }
 0x272   :  { %472 = vst [vmem:[%s799_s7 + $0x18] sm:$0xff] %v468_v1 }

// kernel: transformer_encoder.10
= control target key start
LH: loop header
LB: loop body
LE: loop exit
PB: predicated region body
PF: predicated region fallthrough
CT: control target
= control target key end

     0   :  { %s1228_s24 = smov 0   ;;  %s1230_s25 = smov 0   ;;  %s1363_s0 = inlined_call_operand.vmem [shape: bf16[2,4,16,32], index: 0, kind: input, shape index: {}]   ;;  %s1364_s1 = inlined_call_operand.vmem [shape: bf16[2,4,16,32], index: 1, kind: input, shape index: {}]   ;;  %s1365_s2 = inlined_call_operand.vmem [shape: bf16[2,4,16,32], index: 2, kind: input, shape index: {}]   ;;  %s1366_s3 = inlined_call_operand.vmem [shape: f32[2,1,16], index: 3, kind: input, shape index: {}]   ;;  %s1367_s4 = inlined_call_operand.vmem [shape: bf16[128,128], index: 4, kind: input, shape index: {}]   ;;  %s1368_s5 = inlined_call_operand.vmem [shape: f32[1,128], index: 5, kind: input, shape index: {}]   ;;  %s1369_s6 = inlined_call_operand.vmem [shape: f32[2,16,128], index: 6, kind: input, shape index: {}]   ;;  %s1370_s7 = inlined_call_operand.vmem [shape: f32[2,16,128], index: 7, kind: output, shape index: {}]  }
   0x1   :  { %s1232_s26 = smov 0   ;;  %s1234_s27 = smov 0  }
   0x2   :  { %s1236_s28 = smov 0  }
   0x3 LB: > { %s35_s29 = sadd.s32 1, %s1173_s26  ;;  %s43_s30 = sadd.s32 1, %s1177_s27  ;;  %s1181_s28 = sphi %s1236_s28, %s17_s28   ;;  %s1177_s27 = sphi %s1234_s27, %s1374_s27   ;;  %s1173_s26 = sphi %s1232_s26, %s1373_s26   ;;  %s1169_s25 = sphi %s1230_s25, %s1372_s25   ;;  %s1165_s24 = sphi %s1228_s24, %s1371_s24  }
   0x4   : > { %p37_p0 = scmp.ge.s32.totalorder %s35_s29, 4  ;;  %p1018_p1 = scmp.ge.s32.totalorder %s1181_s28, 1 }
   0x5   : > { %p354_p2 = scmp.lt.s32.totalorder %s1181_s28, 9 }
   0x6   : > { %s1376_s29 = smov (%p37_p0, %s35_s29), 0  ;;  %s1378_s30 = smov (!%p37_p0, %s43_s30), %s1177_s27 }
   0x7   : > { %p355_p3 = pnand %p1018_p1, %p354_p2  ;;  %p45_p4 = scmp.ge.s32.totalorder %s1378_s30, 2 }
   0x8   : > { %p440_p5 = scmp.lt.s32.totalorder (!%p355_p3), %s1169_s25, 1  ;;  %p442_p6 = scmp.lt.s32.totalorder (!%p355_p3), %s1165_s24, 3 }
   0x9   : > { %s1380_s30 = smov (%p45_p4, %s1378_s30), 0  ;;  %358 = sbr.rel (%p355_p3) target bundleno = 1071 (0x42f), region = 48 }
   0xa   : > { %p508_p7 = scmp.eq.s32.totalorder (!%p355_p3), %s1165_s24, 0 }
  0x10   : > { %s1382_s25 = smov (!%p440_p5, %s1169_s25), 1  ;;  %v1183_v0 = vmov (%p508_p7), 0.0  }
  0x11   : > { %s443_s8 = scalar_select %p442_p6, %s1165_s24, 3 }
  0x12   : > { %s1020_s9 = sshll.u32 %s1382_s25, 3  ;;  %s486_s12 = scalar_lea.vmem %s1366_s3, %s1382_s25  ;;  %514 = vst [vmem:[#allocation5] sm:$0xff] (%p508_p7), %v1183_v0  ;;  %515 = vst [vmem:[#allocation5 + $0x8] sm:$0xff] (%p508_p7), %v1183_v0 }
  0x13   : > { %s1019_s13 = sshll.u32 %s443_s8, 1  ;;  %s1048_s14 = sshll.u32 %s1382_s25, 4 }
  0x14   : > { %s449_s15 = sadd.s32 %s1020_s9, %s1019_s13  ;;  %s1274_s18 = scalar_lea.vmem %s1369_s6, %s1048_s14 }
  0x15   : > { %s1276_s19 = sshll.u32 %s449_s15, 2  ;;  %s1281_s22 = scalar_lea.vmem %s1370_s7, %s1048_s14 }
  0x16   : > { %s451_s25 = scalar_lea.vmem %s1363_s0, %s1276_s19  ;;  %s465_s11 = scalar_lea.vmem %s1364_s1, %s1276_s19 }
  0x17   : > { %s479_s15 = scalar_lea.vmem %s1365_s2, %s1276_s19  ;;  %513 = sbr.rel (!%p508_p7) target bundleno = 30 (0x1e), region = 52 }
  0x1e PF: > { %vm524_vm0 = vcmask 261120   ;;  %v1184_v1 = vmov 0.0   ;;  %v1126_v2 = vld [vmem:[%s465_s11] sm:$0xff]   ;;  %vm1185_vm1 = vmmov 0   ;;  %vm598_vm2 = vcmask 130048   ;;  %s1039_s17 = sshll.u32 %s1165_s24, 5 }
  0x1f   : > { %1059 = vmatprep.subr.bf16.mxu0 %v1184_v1  ;;  %525 = vst.msk [vmem:[#allocation4] sm:$0xff] %vm524_vm0, %v1184_v1  ;;  %526 = vst.msk [vmem:[#allocation4 + $0x8] sm:$0xff] %vm524_vm0, %v1184_v1  ;;  %1065 = vmatprep.subr.bf16.mxu1 %v1184_v1  ;;  %v553_v3 = vsel %vm524_vm0, %v1126_v2, 0  ;;  %v1127_v4 = vld [vmem:[%s451_s25] sm:$0xff]   ;;  %vm519_vm3 = vcmask 7168   ;;  %v1186_v14 = vmov -inf  }
  0x20   : > { %1061 = vmatprep.mubr.msk.bf16.mxu0 %vm1185_vm1, %v1184_v1  ;;  %1067 = vmatprep.mubr.msk.bf16.mxu1 %vm1185_vm1, %v1184_v1  ;;  %v1033_v5 = vld [vmem:[%s486_s12] ss:$0 sm:$0xff]  ;;  %520 = vst.msk [vmem:[#allocation2] sm:$0xff] %vm519_vm3, %v1186_v14  ;;  %521 = vst.msk [vmem:[#allocation2 + $0x8] sm:$0xff] %vm519_vm3, %v1186_v14  ;;  %v1187_v15 = vmov 0   ;;  %s739_s19 = sshra.s32 %s1039_s17, 3 }
  0x21   : > { %1060 = vmatpush3.bf16.xpose.msra.mxu0 %v553_v3  ;;  %522 = vst.msk [vmem:[#allocation3] sm:$0xff] %vm519_vm3, %v1184_v1  ;;  %523 = vst.msk [vmem:[#allocation3 + $0x8] sm:$0xff] %vm519_vm3, %v1184_v1  ;;  %1124 = vset.pattern.permute.xlu1 %v1187_v15  ;;  %v1128_v24 = vld [vmem:[%s479_s15] sm:$0xff]   ;;  %s1040_s20 = sshll.u32 %s739_s19, 2  ;;  %p810_p8 = scmp.eq.s32.totalorder %s1165_s24, 3 }
  0x22   : > { %1125 = vset.pattern.permute.xlu0 %v1187_v15  ;;  %1066 = vmatpush3.bf16.msra.mxu1 %v1128_v24  ;;  %s742_s10 = scalar_lea.vmem %s1367_s4, %s1040_s20 }
  0x23   : > { %1071 = vmatprep.subr.bf16.mxu1 %v1184_v1  ;;  %v1129_v51 = vld [vmem:[%s742_s10] sm:$0xff]   ;;  %v1130_v53 = vld [vmem:[%s742_s10 + $0x8] sm:$0xff]  }
  0x26   : > { %v644_v54 = vld [vmem:[#allocation4] sm:$0xff]  ;;  %v645_v56 = vld [vmem:[#allocation4 + $0x8] sm:$0xff] }
  0x27   : > { %v596_v16 = vld [vmem:[#allocation2] sm:$0xff]  ;;  %v597_v19 = vld [vmem:[#allocation2 + $0x8] sm:$0xff] }
  0x28   : > { %1062 = vmatmul.mubr.msk.bf16.vlgmr.msra.gmra.mrb[0].mxu0 %vm524_vm0, %v1127_v4  ;;  %v629_v40 = vld [vmem:[#allocation3] sm:$0xff]  ;;  %v630_v43 = vld [vmem:[#allocation3 + $0x8] sm:$0xff] }
  0xfb   : > { %v589_v6 = vpop.f32.mrb[0].mxu0 }
  0xfc   : > { %v590_v7 = vadd.f32 %v1033_v5, %v589_v6  ;;  %v1063_v8 = vpop.f32.mrb[1].mxu0 }
  0xfd   : > { %v592_v9 = vpop.f32.mrb[2].mxu0 }
  0xfe   : > { %v593_v10 = vadd.f32 %v1033_v5, %v592_v9  ;;  %v1064_v11 = vpop.f32.mrb[3].mxu0  ;;  %v599_v12 = vsel %vm598_vm2, %v590_v7, -inf  ;;  %v747_v9 = vld [vmem:[#allocation5] sm:$0xff] }
  0xff   : > { %600 = vmax.xlane.f32.xlu0 %v599_v12  ;;  %v748_v11 = vld [vmem:[#allocation5 + $0x8] sm:$0xff] }
 0x100   : > { %v602_v13 = vsel %vm598_vm2, %v593_v10, -inf }
 0x103   : > { %603 = vmax.xlane.f32.xlu0 %v602_v13 }
 0x18c   : > { %v601_v17 = vpop.xlane.xlu0 %600 }
 0x18d   : > { %v605_v18 = vmax.f32 %v596_v16, %v601_v17  ;;  %v815_v17 = vld [vmem:[%s1274_s18] sm:$0xff] (%p810_p8) }
 0x18f   : > { %v607_v20 = vsub.f32 %v596_v16, %v605_v18  ;;  %715 = vst.msk [vmem:[#allocation2] sm:$0xff] %vm519_vm3, %v605_v18  ;;  %615 = vperm.xlu1 %1124, %v605_v18  }
 0x190   : > { %v604_v21 = vpop.xlane.xlu0 %603 }
 0x191   : > { %v606_v22 = vmax.f32 %v597_v19, %v604_v21  ;;  %v609_v37 = vmul.f32 1.442695, %v607_v20  ;;  %v816_v21 = vld [vmem:[%s1274_s18 + $0x8] sm:$0xff] (%p810_p8) }
 0x193   : > { %v608_v23 = vsub.f32 %v597_v19, %v606_v22  ;;  %716 = vst.msk [vmem:[#allocation2 + $0x8] sm:$0xff] %vm519_vm3, %v606_v22  ;;  %620 = vperm.xlu1 %1124, %v606_v22   ;;  %v1045_v19 = vld [vmem:[%s1368_s5] ss:$0 sm:$0xff] (%p810_p8) }
 0x195   : > { %v611_v36 = vmul.f32 1.442695, %v608_v23 }
 0x20e   : > { %v616_v25 = vpop.permute.xlu1 %615 }
 0x20f   : > { %v623_v26 = vsub.f32 %v590_v7, %v616_v25 }
 0x211   : > { %v625_v27 = vmul.f32 1.442695, %v623_v26 }
 0x212   : > { %v621_v28 = vpop.permute.xlu1 %620 }
 0x213   : > { %1131 = vpow2.f32 %v625_v27  ;;  %v624_v29 = vsub.f32 %v593_v10, %v621_v28 }
 0x215   : > { %v627_v30 = vmul.f32 1.442695, %v624_v29 }
 0x217   : > { %1133 = vpow2.f32 %v627_v30 }
 0x218   : > { %1135 = vpow2.f32 %v611_v36 }
 0x219   : > { %1137 = vpow2.f32 %v609_v37 }
 0x21d   : > { %v1132_v31 = vpop.eup %1131 }
 0x21e   : > { %v633_v32 = vsel %vm598_vm2, %v1132_v31, 0.0 }
 0x21f   : > { %634 = vadd.xlane.f32.xlu0 %v633_v32 }
 0x221   : > { %v1134_v33 = vpop.eup %1133 }
 0x222   : > { %v636_v34 = vsel %vm598_vm2, %v1134_v33, 0.0  ;;  %v658_v35 = vpack.c.bf16 %v1134_v33, %v1132_v31  ;;  %v1136_v38 = vpop.eup %1135 }
 0x223   : > { %637 = vadd.xlane.f32.xlu1 %v636_v34  ;;  %v1138_v39 = vpop.eup %1137  ;;  %v632_v45 = vmul.f32 %v1136_v38, %v630_v43 }
 0x224   : > { %1068 = vmatmul.mubr.msk.bf16.vlgmr.msra.gmra.mrb[0].mxu1 %vm598_vm2, %v658_v35  ;;  %v631_v41 = vmul.f32 %v1138_v39, %v629_v40 }
 0x225   : > { %1075 = vmatprep.mubr.msk.bf16.mxu1 %vm1185_vm1, %v1184_v1  ;;  %1072 = vmatpush3.bf16.msra.mxu1 %v1129_v51 }
 0x226   : > { %1073 = vmatprep.subr.bf16.mxu1 %v1184_v1 }
 0x229   : > { %1074 = vmatpush3.bf16.msra.mxu1 %v1130_v53 }
 0x234   : > { %653 = vperm.xlu1 %1124, %v1136_v38  }
 0x235   : > { %648 = vperm.xlu0 %1125, %v1138_v39  }
 0x2ac   : > { %v635_v42 = vpop.xlane.xlu0 %634 }
 0x2ad   : > { %v639_v44 = vadd.f32 %v635_v42, %v631_v41 }
 0x2af   : > { %642 = vst.msk [vmem:[#allocation3] sm:$0xff] %vm519_vm3, %v639_v44 }
 0x2b0   : > { %v638_v46 = vpop.xlane.xlu1 %637 }
 0x2b1   : > { %v640_v47 = vadd.f32 %v638_v46, %v632_v45 }
 0x2b3   : > { %643 = vst.msk [vmem:[#allocation3 + $0x8] sm:$0xff] %vm519_vm3, %v640_v47 }
 0x2b4   : > { %v649_v55 = vpop.permute.xlu0 %648  ;;  %v654_v57 = vpop.permute.xlu1 %653 }
 0x2b5   : > { %v656_v58 = vmul.f32 %v649_v55, %v644_v54  ;;  %v657_v60 = vmul.f32 %v654_v57, %v645_v56 }
 0x2b6   : > { %v722_v48 = vld [vmem:[#allocation3] sm:$0xff] }
 0x2b7   : > { %1139 = vrcp.f32 %v722_v48 }
 0x2ba   : > { %v723_v49 = vld [vmem:[#allocation3 + $0x8] sm:$0xff] }
 0x2bb   : > { %1141 = vrcp.f32 %v723_v49 }
 0x2c1   : > { %v1140_v50 = vpop.eup %1139 }
 0x2c2   : > { %728 = vperm.xlu0 %1125, %v1140_v50  }
 0x2c5   : > { %v1142_v52 = vpop.eup %1141 }
 0x2c6   : > { %733 = vperm.xlu0 %1125, %v1142_v52  }
 0x2f7   : > { %v704_v59 = vpop.f32.mrb[0].mxu1 }
 0x2f8   : > { %v711_v61 = vadd.f32 %v704_v59, %v656_v58  ;;  %v1069_v62 = vpop.f32.mrb[1].mxu1 }
 0x2f9   : > { %v707_v63 = vpop.f32.mrb[2].mxu1 }
 0x2fa   : > { %713 = vst.msk [vmem:[#allocation4] sm:$0xff] %vm524_vm0, %v711_v61  ;;  %v712_v0 = vadd.f32 %v707_v63, %v657_v60  ;;  %v1070_v2 = vpop.f32.mrb[3].mxu1 }
 0x2fc   : > { %714 = vst.msk [vmem:[#allocation4 + $0x8] sm:$0xff] %vm524_vm0, %v712_v0 }
 0x301   : > { %v720_v3 = vld [vmem:[#allocation4] sm:$0xff] }
 0x303   : > { %v721_v4 = vld [vmem:[#allocation4 + $0x8] sm:$0xff] }
 0x341   : > { %v729_v1 = vpop.permute.xlu0 %728 }
 0x342   : > { %v736_v6 = vmul.f32 %v729_v1, %v720_v3 }
 0x345   : > { %v734_v5 = vpop.permute.xlu0 %733 }
 0x346   : > { %v737_v7 = vmul.f32 %v734_v5, %v721_v4 }
 0x348   : > { %v749_v8 = vpack.c.bf16 %v737_v7, %v736_v6 }
 0x34a   : > { %1076 = vmatmul.mubr.msk.bf16.vlgmr.msra.gmra.mrb[4].mxu1 %vm524_vm0, %v749_v8 }
 0x41c   : > { %814 = sbr.rel (!%p810_p8) target bundleno = 1071 (0x42f), region = 64 }
 0x41d   : > { %v799_v10 = vpop.f32.mrb[4].mxu1 }
 0x41e   : > { %v806_v12 = vadd.f32 %v799_v10, %v747_v9  ;;  %v1077_v13 = vpop.f32.mrb[5].mxu1 }
 0x41f   : > { %v802_v14 = vpop.f32.mrb[6].mxu1 }
 0x420   : > { %808 = vst [vmem:[#allocation5] sm:$0xff] %v806_v12  ;;  %v807_v15 = vadd.f32 %v802_v14, %v748_v11  ;;  %v1078_v16 = vpop.f32.mrb[7].mxu1 }
 0x422   : > { %809 = vst [vmem:[#allocation5 + $0x8] sm:$0xff] %v807_v15 }
 0x427   : > { %v817_v18 = vld [vmem:[#allocation5] sm:$0xff] }
 0x428   : > { %v819_v20 = vadd.f32 %v817_v18, %v815_v17 }
 0x429   : > { %v818_v22 = vld [vmem:[#allocation5 + $0x8] sm:$0xff] }
 0x42a   : > { %v820_v23 = vadd.f32 %v818_v22, %v816_v21  ;;  %v828_v24 = vadd.f32 %v1045_v19, %v819_v20 }
 0x42c   : > { %v829_v25 = vadd.f32 %v1045_v19, %v820_v23  ;;  %830 = vst [vmem:[%s1281_s22] sm:$0xff] %v828_v24 }
 0x42e   : > { %831 = vst [vmem:[%s1281_s22 + $0x8] sm:$0xff] %v829_v25 }
 0x42f PF: > { %s17_s28 = sadd.s32 1, %s1181_s28   ;;  %s1371_s24 = smov %s1173_s26 }
 0x430   : > { %p14_p9 = scmp.ge.s32.totalorder %s17_s28, 10   ;;  %s1372_s25 = smov %s1177_s27 }
 0x431   : > { %s1373_s26 = smov %s1376_s29  ;;  %s1374_s27 = smov %s1380_s30 }
 0x432   :  { %16 = sbr.rel (!%p14_p9) target bundleno = 3 (0x3), region = 107 }

</bundles_post_ra>
